<compile_context>
chip_gen: v7x
topology: tpu7x:2x2x1
jax: 0.10.0
libtpu: 0.0.40
codegen_flags: <defaults>
</compile_context>

<pallas_src>
import numpy as np
import jax
import jax.numpy as jnp
from jax import lax
from jax.experimental import pallas as pl
from jax.experimental.pallas import tpu as pltpu


# ============================================================================
# Pallas kernel 1: image features   (B, K) @ (K, D) -> (B, D), K-tiled
# ============================================================================
def _img_feat_kernel(x_ref, w_ref, o_ref):
    k = pl.program_id(0)

    @pl.when(k == 0)
    def _():
        o_ref[...] = jnp.zeros_like(o_ref)

    o_ref[...] += jnp.dot(x_ref[...], w_ref[...],
                          preferred_element_type=jnp.float32)


def image_features(x16, w16):
    """K-tiled MXU matmul, bf16 operands, f32 accumulation in the resident output."""
    M, K = x16.shape
    _, N = w16.shape
    tk = K
    for cand in (512, 256, 128):
        if K % cand == 0:
            tk = cand
            break
    return pl.pallas_call(
        _img_feat_kernel,
        out_shape=jax.ShapeDtypeStruct((M, N), jnp.float32),
        grid=(K // tk,),
        in_specs=[pl.BlockSpec((M, tk), lambda k: (0, k)),
                  pl.BlockSpec((tk, N), lambda k: (k, 0))],
        out_specs=pl.BlockSpec((M, N), lambda k: (0, 0)),
        compiler_params=pltpu.CompilerParams(
            dimension_semantics=("arbitrary",),
            vmem_limit_bytes=32 * 1024 * 1024),
    )(x16, w16)


# ============================================================================
# Pallas kernel 2: fused prompt head, ALL tasks in one launch (no grid).
#   ctx_proj[n]  = cm[n] @ w_ctx            (cm = mean over layers & ctx tokens)
#   vis_shift[n] = vm[n] @ w_vis
#   text_T[n]    = class_embed^T + ctx_proj[n][:,None]          (D, CPAD)
#   x_shift[n]   = img_feat[n]   + vis_shift[n][None,:]         (BP, D)
#   logits[n]    = x_shift[n] @ text_T[n]                       (BP, CPAD), unscaled
# Residuals for bwd: ctx_proj, vis_shift (N, D) only.
# ============================================================================
def _head_fwd_kernel(cm_ref, vm_ref, xf_ref, cet_ref, wc_ref, wv_ref,
                     logits_ref, cp_ref, vsh_ref):
    ctx_proj = jnp.dot(cm_ref[...], wc_ref[...],
                       preferred_element_type=jnp.float32)          # (N, D)
    vis_shift = jnp.dot(vm_ref[...], wv_ref[...],
                        preferred_element_type=jnp.float32)         # (N, D)
    cp_ref[...] = ctx_proj
    vsh_ref[...] = vis_shift
    text_t = cet_ref[...][None, :, :] + ctx_proj[:, :, None]        # (N, D, CPAD)
    x_shift = xf_ref[...].astype(jnp.float32) + vis_shift[:, None, :]  # (N, BP, D)
    logits_ref[...] = jnp.einsum(
        'nbd,ndc->nbc',
        x_shift.astype(jnp.bfloat16), text_t.astype(jnp.bfloat16),
        preferred_element_type=jnp.float32)


def _head_fwd_call(cm, vm, xf16, consts):
    N, D = cm.shape
    BP = xf16.shape[1]
    ce_t = consts["ce_t"]
    CPAD = ce_t.shape[1]
    full2 = lambda: (0, 0)
    full3 = lambda: (0, 0, 0)
    return pl.pallas_call(
        _head_fwd_kernel,
        out_shape=(jax.ShapeDtypeStruct((N, BP, CPAD), jnp.float32),
                   jax.ShapeDtypeStruct((N, D), jnp.float32),
                   jax.ShapeDtypeStruct((N, D), jnp.float32)),
        in_specs=[pl.BlockSpec((N, D), full2),
                  pl.BlockSpec((N, D), full2),
                  pl.BlockSpec((N, BP, D), full3),
                  pl.BlockSpec((D, CPAD), full2),
                  pl.BlockSpec((D, D), full2),
                  pl.BlockSpec((D, D), full2)],
        out_specs=(pl.BlockSpec((N, BP, CPAD), full3),
                   pl.BlockSpec((N, D), full2),
                   pl.BlockSpec((N, D), full2)),
    )(cm.astype(jnp.bfloat16), vm.astype(jnp.bfloat16), xf16,
      ce_t, consts["wc"], consts["wv"])


def _head_bwd_kernel(g_ref, xf_ref, ce_ref, cp_ref, vsh_ref, wct_ref, wvt_ref,
                     gcm_ref, gvm_ref):
    g = g_ref[...]                                                   # (N, BP, CPAD) f32
    # recompute text / x_shift from the tiny residuals (VPU adds)
    x_shift = xf_ref[...].astype(jnp.float32) + vsh_ref[...][:, None, :]   # (N, BP, D)
    text = ce_ref[...][None, :, :] + cp_ref[...][:, None, :]               # (N, CPAD, D)
    # d logits / d ctx_proj[n,d]  = sum_{b,c} g[n,b,c] * x_shift[n,b,d]
    s = jnp.sum(g, axis=2, keepdims=True)                            # (N, BP, 1)
    g_cp = jnp.sum(s * x_shift, axis=1)                              # (N, D)
    # d logits / d vis_shift[n,d] = sum_{b,c} g[n,b,c] * text[n,c,d]
    t = jnp.sum(g, axis=1)                                           # (N, CPAD)
    g_vsh = jnp.sum(t[:, :, None] * text, axis=1)                    # (N, D)
    # chain through the projections with the pre-transposed weights (no XLU transpose)
    gcm_ref[...] = jnp.dot(g_cp.astype(jnp.bfloat16), wct_ref[...],
                           preferred_element_type=jnp.float32)       # (N, D)
    gvm_ref[...] = jnp.dot(g_vsh.astype(jnp.bfloat16), wvt_ref[...],
                           preferred_element_type=jnp.float32)       # (N, D)


def _head_bwd_call(g, xf16, cp, vsh, consts):
    N, BP, CPAD = g.shape
    D = cp.shape[1]
    full2 = lambda: (0, 0)
    full3 = lambda: (0, 0, 0)
    return pl.pallas_call(
        _head_bwd_kernel,
        out_shape=(jax.ShapeDtypeStruct((N, D), jnp.float32),
                   jax.ShapeDtypeStruct((N, D), jnp.float32)),
        in_specs=[pl.BlockSpec((N, BP, CPAD), full3),
                  pl.BlockSpec((N, BP, D), full3),
                  pl.BlockSpec((CPAD, D), full2),
                  pl.BlockSpec((N, D), full2),
                  pl.BlockSpec((N, D), full2),
                  pl.BlockSpec((D, D), full2),
                  pl.BlockSpec((D, D), full2)],
        out_specs=(pl.BlockSpec((N, D), full2),
                   pl.BlockSpec((N, D), full2)),
    )(g, xf16, consts["ce"], cp, vsh, consts["wct"], consts["wvt"])


@jax.custom_vjp
def prompt_head(cm, vm, xf16, consts):
    logits, _, _ = _head_fwd_call(cm, vm, xf16, consts)
    return logits


def _prompt_head_fwd(cm, vm, xf16, consts):
    logits, cp, vsh = _head_fwd_call(cm, vm, xf16, consts)
    return logits, (xf16, cp, vsh, consts)


def _prompt_head_bwd(res, g):
    xf16, cp, vsh, consts = res
    g_cm, g_vm = _head_bwd_call(g, xf16, cp, vsh, consts)
    # only cm / vm are differentiated in the inner loop; the rest are constants and
    # their zero cotangents are DCE'd by XLA.
    return (g_cm, g_vm, jnp.zeros_like(xf16),
            jax.tree_util.tree_map(jnp.zeros_like, consts))


prompt_head.defvjp(_prompt_head_fwd, _prompt_head_bwd)


# ============================================================================
# Jitted meta-forward: image features once, unrolled meta_step loop, tasks batched.
# ============================================================================
def _meta_forward(image, label, sup_idx, sup_mask, qry_idx, qry_mask, lr, params):
    mp = params["model"]
    ctx_init = params["ctx_init"]
    vis_init = params["vis_ctx_init"]
    L, n_ctx, D = ctx_init.shape
    meta_step = params["con_list"].shape[1]
    N = sup_idx.shape[0]

    # ---- image features (K-tiled Pallas matmul), batch padded to bf16 sublane tile ----
    B = image.shape[0]
    x_flat = image.reshape(B, -1).astype(jnp.bfloat16)
    BPAD = ((B + 15) // 16) * 16
    if BPAD != B:
        x_flat = jnp.pad(x_flat, ((0, BPAD - B), (0, 0)))
    img_feat_all = image_features(x_flat, mp["w_img16"])            # (BPAD, D) f32

    img_sup = img_feat_all[sup_idx].astype(jnp.bfloat16)            # (N, SP, D)
    img_qry = img_feat_all[qry_idx].astype(jnp.bfloat16)            # (N, QP, D)
    lbl_sup = label[sup_idx]
    lbl_qry = label[qry_idx]

    consts = {"ce": mp["class_embed_pad"],      # (CPAD, D) f32
              "ce_t": mp["class_embed_t"],      # (D, CPAD) f32
              "wc": mp["w_ctx16"], "wv": mp["w_vis16"],       # (D, D) bf16
              "wct": mp["w_ctx_t16"], "wvt": mp["w_vis_t16"]}  # (D, D) bf16
    cls_mask = mp["class_mask"]
    scale = mp["logit_scale"]

    ratio = lr / params["init_lr"]
    reg_denom = float(L * n_ctx * D)

    def masked_ce(logits, labels, mask):
        logits = jnp.where(cls_mask[None, None, :], logits, jnp.float32(-1e30))
        logp = jax.nn.log_softmax(logits, axis=-1)
        nll = -jnp.take_along_axis(logp, labels[..., None], axis=-1)[..., 0]
        return jnp.sum(nll * mask, axis=-1) / jnp.maximum(jnp.sum(mask, axis=-1), 1.0)

    def reg_mlp(x2d, p):                 # tiny (N, 3L) MLP: plain jnp, XLA fuses it
        w1, b1, w2, b2 = p
        h = jnp.maximum(x2d @ w1 + b1, 0.0)
        return h @ w2 + b2

    def lslr_update(cur, ga, gb, gen, con_k, alpha_k, beta_k):
        gen_con, gen_alpha, gen_beta = jnp.split(gen, 3, axis=1)     # (N, L) each
        c0 = 1.0 - gen_con * con_k[None, :] * ratio
        c1 = gen_alpha * alpha_k[None, :] * ratio
        c2 = gen_beta * beta_k[None, :] * ratio
        return (c0[:, :, None, None] * cur
                - c1[:, :, None, None] * ga
                - c2[:, :, None, None] * gb)

    def support_loss(c, v):
        cm = jnp.mean(c, axis=(1, 2))     # (N, D)  mean over layers & ctx tokens
        vm = jnp.mean(v, axis=(1, 2))
        logits = scale * prompt_head(cm, vm, img_sup, consts)
        # sum of per-task CE: grads per task slice equal per-task grads
        return jnp.sum(masked_ce(logits, lbl_sup, sup_mask))

    grad_fn = jax.grad(support_loss, argnums=(0, 1))

    ctx = jnp.broadcast_to(ctx_init[None], (N, L, n_ctx, D))
    vis = jnp.broadcast_to(vis_init[None], (N, L, n_ctx, D))

    # meta_step is tiny -> Python-unrolled loop inside jit
    for k in range(meta_step):
        g_ctx, g_vis = grad_fn(ctx, vis)
        # analytic grads of reg_text = mean(ctx**2), reg_image = mean(vis_ctx**2)
        reg_g_ctx = (2.0 / reg_denom) * ctx
        reg_g_vis = (2.0 / reg_denom) * vis

        con_k = params["con_list"][:, k]
        alpha_k = params["alpha_list"][:, k]
        beta_k = params["beta_list"][:, k]

        emb_t = jnp.concatenate([jnp.mean(ctx, axis=(2, 3)),
                                 jnp.mean(g_ctx, axis=(2, 3)),
                                 jnp.mean(reg_g_ctx, axis=(2, 3))], axis=1)
        gen_t = reg_mlp(emb_t, params["reg_t"])
        new_ctx = lslr_update(ctx, g_ctx, reg_g_ctx, gen_t, con_k, alpha_k, beta_k)

        emb_i = jnp.concatenate([jnp.mean(vis, axis=(2, 3)),
                                 jnp.mean(g_vis, axis=(2, 3)),
                                 jnp.mean(reg_g_vis, axis=(2, 3))], axis=1)
        gen_i = reg_mlp(emb_i, params["reg_i"])
        new_vis = lslr_update(vis, g_vis, reg_g_vis, gen_i, con_k, alpha_k, beta_k)

        ctx, vis = new_ctx, new_vis

    # query pass with the adapted prompts (original appends only at the last step)
    cm_f = jnp.mean(ctx, axis=(1, 2))
    vm_f = jnp.mean(vis, axis=(1, 2))
    logits_q = scale * prompt_head(cm_f, vm_f, img_qry, consts)
    per_task_q = masked_ce(logits_q, lbl_qry, qry_mask)
    return jnp.mean(per_task_q)


_meta_forward_jit = jax.jit(_meta_forward)


# ============================================================================
# MAML few-shot classifier (Pallas version)
# ============================================================================
class MAMLFewShotClassifierPallas:
    def __init__(self, num_layers, meta_step, init_lr, model_params,
                 ctx_init, vis_ctx_init, reg_t_params, reg_i_params):
        self.layers = num_layers
        self.meta_step = meta_step
        self.init_lr = init_lr
        self.init_weight_decay = 0.0005
        # LSLRGradientDescentLearningRule parameters: (layers, meta_step)
        con = jnp.ones((num_layers, meta_step), jnp.float32) * init_lr * self.init_weight_decay
        alpha = jnp.ones((num_layers, meta_step), jnp.float32) * init_lr
        beta = jnp.ones((num_layers, meta_step), jnp.float32) * init_lr

        # one-time derived constants: bf16 weights + pre-transposed copies
        mp = dict(model_params)
        mp["w_img16"] = model_params["w_img"].astype(jnp.bfloat16)
        mp["w_ctx16"] = model_params["w_ctx"].astype(jnp.bfloat16)
        mp["w_vis16"] = model_params["w_vis"].astype(jnp.bfloat16)
        mp["w_ctx_t16"] = model_params["w_ctx"].T.astype(jnp.bfloat16)
        mp["w_vis_t16"] = model_params["w_vis"].T.astype(jnp.bfloat16)
        mp["class_embed_t"] = model_params["class_embed_pad"].T      # (D, CPAD) f32

        self.params = {
            "model": mp,
            "ctx_init": ctx_init,
            "vis_ctx_init": vis_ctx_init,
            "reg_t": reg_t_params,
            "reg_i": reg_i_params,
            "con_list": con,
            "alpha_list": alpha,
            "beta_list": beta,
            "init_lr": jnp.float32(init_lr),
        }

    def forward(self, image, label, domain, lr):
        # ---- host-side leave-one-domain-out split (static; mirrors the original) ----
        dd = list(np.asarray(domain).tolist())
        N = len(set(dd))
        train_dm = [list(range(N)) for _ in range(N)]
        test_dm = [[train_dm[i].pop(i)] for i in range(N)]
        index_train = [[i for i, l in enumerate(dd) if l in train_dm[j]] for j in range(N)]
        index_test = [[i for i, l in enumerate(dd) if l in test_dm[j]] for j in range(N)]
        valid = [j for j in range(N)
                 if len(index_train[j]) > 0 and len(index_test[j]) > 0]

        def pad_tasks(lists, mult=16):       # 16 = bf16 sublane tile
            m = max(len(lists[j]) for j in valid)
            P = max(mult, ((m + mult - 1) // mult) * mult)
            idx = np.zeros((len(valid), P), np.int32)
            msk = np.zeros((len(valid), P), np.float32)
            for r, j in enumerate(valid):
                n = len(lists[j])
                idx[r, :n] = np.asarray(lists[j], np.int32)
                msk[r, :n] = 1.0
            return jnp.asarray(idx), jnp.asarray(msk)

        sup_idx, sup_mask = pad_tasks(index_train)
        qry_idx, qry_mask = pad_tasks(index_test)
        return _meta_forward_jit(image, jnp.asarray(label), sup_idx, sup_mask,
                                 qry_idx, qry_mask, jnp.float32(lr), self.params)


# ============================================================================
# main
# ============================================================================
if __name__ == "__main__":
    key = jax.random.PRNGKey(0)
    keys = jax.random.split(key, 12)

    # small shapes (lane-dense embed / class dims)
    L, META_STEP, INIT_LR, CALL_LR = 4, 2, 0.1, 0.05
    N_DOMAINS, PER_DOMAIN = 3, 2
    B = N_DOMAINS * PER_DOMAIN
    C, H, W = 4, 16, 16
    NUM_CLASSES, N_CTX = 5, 8
    D = 128          # embedding dim (full 128 lanes)
    CPAD = 128       # class dim padded to full lanes; invalid classes masked in CE

    image = jax.random.normal(keys[0], (B, C, H, W), jnp.float32)   # NCHW
    label = jax.random.randint(keys[1], (B,), 0, NUM_CLASSES).astype(jnp.int32)
    domain = np.repeat(np.arange(N_DOMAINS), PER_DOMAIN)            # host array

    class_embed = 0.02 * jax.random.normal(keys[5], (NUM_CLASSES, D), jnp.float32)
    model_params = {
        "w_img": 0.02 * jax.random.normal(keys[2], (C * H * W, D), jnp.float32),
        "w_ctx": 0.02 * jax.random.normal(keys[3], (D, D), jnp.float32),
        "w_vis": 0.02 * jax.random.normal(keys[4], (D, D), jnp.float32),
        "class_embed_pad": jnp.zeros((CPAD, D), jnp.float32).at[:NUM_CLASSES].set(class_embed),
        "class_mask": jnp.arange(CPAD) < NUM_CLASSES,
        "logit_scale": jnp.float32(5.0),
    }
    ctx_init = 0.02 * jax.random.normal(keys[6], (L, N_CTX, D), jnp.float32)
    vis_ctx_init = 0.02 * jax.random.normal(keys[7], (L, N_CTX, D), jnp.float32)

    d3 = 3 * L
    reg_t_params = (0.1 * jax.random.normal(keys[8], (d3, d3), jnp.float32),
                    jnp.zeros((d3,), jnp.float32),
                    0.1 * jax.random.normal(keys[9], (d3, d3), jnp.float32),
                    jnp.zeros((d3,), jnp.float32))
    reg_i_params = (0.1 * jax.random.normal(keys[10], (d3, d3), jnp.float32),
                    jnp.zeros((d3,), jnp.float32),
                    0.1 * jax.random.normal(keys[11], (d3, d3), jnp.float32),
                    jnp.zeros((d3,), jnp.float32))

    maml = MAMLFewShotClassifierPallas(
        num_layers=L, meta_step=META_STEP, init_lr=INIT_LR,
        model_params=model_params, ctx_init=ctx_init,
        vis_ctx_init=vis_ctx_init,
        reg_t_params=reg_t_params, reg_i_params=reg_i_params)

    loss = maml.forward(image, label, domain, lr=CALL_LR)
    loss = jax.block_until_ready(loss)
    assert np.isfinite(float(loss)), "loss is not finite"
    print("KERNEL_OK")
</pallas_src>

<mosaic_0001>
module attributes {stable_mosaic.version = 11 : i64} {
  func.func @_img_feat_kernel(%arg0: i32, %arg1: memref<16x512xbf16, #tpu.memory_space<vmem>>, %arg2: memref<512x128xbf16, #tpu.memory_space<vmem>>, %arg3: memref<16x128xf32, #tpu.memory_space<vmem>>) attributes {dimension_semantics = [#tpu.dimension_semantics<arbitrary>], iteration_bounds = array<i64: 2>, scalar_prefetch = 0 : i64, scratch_operands = 0 : i64, tpu.core_type = #tpu.core_type<tc>, window_params = [{transform_indices = @transform_0, window_bounds = array<i64: 16, 512>}, {transform_indices = @transform_1, window_bounds = array<i64: 512, 128>}, {pipeline_mode = #tpu.pipeline_mode<synchronous>, transform_indices = @transform_2, window_bounds = array<i64: 16, 128>}]} {
    %c0_i32 = arith.constant 0 : i32
    %0 = arith.cmpi eq, %arg0, %c0_i32 : i32
    %1 = arith.extui %0 : i1 to i32
    %c0_i32_0 = arith.constant 0 : i32
    %2 = arith.cmpi ne, %1, %c0_i32_0 : i32
    scf.if %2 {
      %cst_8 = arith.constant 0.000000e+00 : f32
      %9 = vector.broadcast %cst_8 : f32 to vector<16x128xf32>
      %c0_9 = arith.constant 0 : index
      %c0_10 = arith.constant 0 : index
      %10 = vector.load %arg3[%c0_9, %c0_10] : memref<16x128xf32, #tpu.memory_space<vmem>>, vector<16x128xf32>
      tpu.vector_store %arg3[%c0_9, %c0_10], %9 {strides = array<i32>} : memref<16x128xf32, #tpu.memory_space<vmem>>, vector<16x128xf32>,
    } else {
    }
    %c0 = arith.constant 0 : index
    %c0_1 = arith.constant 0 : index
    %3 = vector.load %arg3[%c0, %c0_1] : memref<16x128xf32, #tpu.memory_space<vmem>>, vector<16x128xf32>
    %c0_2 = arith.constant 0 : index
    %c0_3 = arith.constant 0 : index
    %4 = vector.load %arg1[%c0_2, %c0_3] : memref<16x512xbf16, #tpu.memory_space<vmem>>, vector<16x512xbf16>
    %c0_4 = arith.constant 0 : index
    %c0_5 = arith.constant 0 : index
    %5 = vector.load %arg2[%c0_4, %c0_5] : memref<512x128xbf16, #tpu.memory_space<vmem>>, vector<512x128xbf16>
    %cst = arith.constant dense<0.000000e+00> : vector<16x128xf32>
    %6 = tpu.matmul %4, %5, %cst {dimension_numbers = #tpu.dot_dimension_numbers<[1], [0], [0], [1], [0, 0, 1, 1], [], []>} : vector<16x512xbf16>, vector<512x128xbf16>, vector<16x128xf32> -> vector<16x128xf32>
    %7 = arith.addf %3, %6 : vector<16x128xf32>
    %c0_6 = arith.constant 0 : index
    %c0_7 = arith.constant 0 : index
    %8 = vector.load %arg3[%c0_6, %c0_7] : memref<16x128xf32, #tpu.memory_space<vmem>>, vector<16x128xf32>
    tpu.vector_store %arg3[%c0_6, %c0_7], %7 {strides = array<i32>} : memref<16x128xf32, #tpu.memory_space<vmem>>, vector<16x128xf32>,
    return
  }
  func.func @transform_0(%arg0: i32) -> (i32, i32) {
    %c0_i32 = arith.constant 0 : i32
    %c0_i32_0 = arith.constant 0 : i32
    return %c0_i32, %arg0 : i32, i32
  }
  func.func @transform_1(%arg0: i32) -> (i32, i32) {
    %c0_i32 = arith.constant 0 : i32
    %c0_i32_0 = arith.constant 0 : i32
    return %arg0, %c0_i32 : i32, i32
  }
  func.func @transform_2(%arg0: i32) -> (i32, i32) {
    %c0_i32 = arith.constant 0 : i32
    %c0_i32_0 = arith.constant 0 : i32
    %c0_i32_1 = arith.constant 0 : i32
    return %c0_i32, %c0_i32_0 : i32, i32
  }
}

module attributes {stable_mosaic.version = 11 : i64} {
  func.func @_head_fwd_kernel(%arg0: memref<3x128xbf16, #tpu.memory_space<vmem>>, %arg1: memref<3x128xbf16, #tpu.memory_space<vmem>>, %arg2: memref<3x16x128xbf16, #tpu.memory_space<vmem>>, %arg3: memref<128x128xf32, #tpu.memory_space<vmem>>, %arg4: memref<128x128xbf16, #tpu.memory_space<vmem>>, %arg5: memref<128x128xbf16, #tpu.memory_space<vmem>>, %arg6: memref<3x16x128xf32, #tpu.memory_space<vmem>>, %arg7: memref<3x128xf32, #tpu.memory_space<vmem>>, %arg8: memref<3x128xf32, #tpu.memory_space<vmem>>) attributes {dimension_semantics = [], scalar_prefetch = 0 : i64, scratch_operands = 0 : i64, tpu.core_type = #tpu.core_type<tc>} {
    %c0 = arith.constant 0 : index
    %c0_0 = arith.constant 0 : index
    %0 = vector.load %arg0[%c0, %c0_0] : memref<3x128xbf16, #tpu.memory_space<vmem>>, vector<3x128xbf16>
    %c0_1 = arith.constant 0 : index
    %c0_2 = arith.constant 0 : index
    %1 = vector.load %arg4[%c0_1, %c0_2] : memref<128x128xbf16, #tpu.memory_space<vmem>>, vector<128x128xbf16>
    %cst = arith.constant dense<0.000000e+00> : vector<3x128xf32>
    %2 = tpu.matmul %0, %1, %cst {dimension_numbers = #tpu.dot_dimension_numbers<[1], [0], [0], [1], [0, 0, 1, 1], [], []>} : vector<3x128xbf16>, vector<128x128xbf16>, vector<3x128xf32> -> vector<3x128xf32>
    %c0_3 = arith.constant 0 : index
    %c0_4 = arith.constant 0 : index
    %3 = vector.load %arg1[%c0_3, %c0_4] : memref<3x128xbf16, #tpu.memory_space<vmem>>, vector<3x128xbf16>
    %c0_5 = arith.constant 0 : index
    %c0_6 = arith.constant 0 : index
    %4 = vector.load %arg5[%c0_5, %c0_6] : memref<128x128xbf16, #tpu.memory_space<vmem>>, vector<128x128xbf16>
    %cst_7 = arith.constant dense<0.000000e+00> : vector<3x128xf32>
    %5 = tpu.matmul %3, %4, %cst_7 {dimension_numbers = #tpu.dot_dimension_numbers<[1], [0], [0], [1], [0, 0, 1, 1], [], []>} : vector<3x128xbf16>, vector<128x128xbf16>, vector<3x128xf32> -> vector<3x128xf32>
    %c0_8 = arith.constant 0 : index
    %c0_9 = arith.constant 0 : index
    %6 = vector.load %arg7[%c0_8, %c0_9] : memref<3x128xf32, #tpu.memory_space<vmem>>, vector<3x128xf32>
    tpu.vector_store %arg7[%c0_8, %c0_9], %2 {strides = array<i32>} : memref<3x128xf32, #tpu.memory_space<vmem>>, vector<3x128xf32>,
    %c0_10 = arith.constant 0 : index
    %c0_11 = arith.constant 0 : index
    %7 = vector.load %arg8[%c0_10, %c0_11] : memref<3x128xf32, #tpu.memory_space<vmem>>, vector<3x128xf32>
    tpu.vector_store %arg8[%c0_10, %c0_11], %5 {strides = array<i32>} : memref<3x128xf32, #tpu.memory_space<vmem>>, vector<3x128xf32>,
    %c0_12 = arith.constant 0 : index
    %c0_13 = arith.constant 0 : index
    %8 = vector.load %arg3[%c0_12, %c0_13] : memref<128x128xf32, #tpu.memory_space<vmem>>, vector<128x128xf32>
    %9 = vector.shape_cast %8 : vector<128x128xf32> to vector<1x128x128xf32>
    %10 = vector.shape_cast %2 : vector<3x128xf32> to vector<3x128x1xf32>
    %11 = vector.broadcast %9 : vector<1x128x128xf32> to vector<3x128x128xf32>
    %12 = vector.broadcast %10 : vector<3x128x1xf32> to vector<3x128x128xf32>
    %13 = arith.addf %11, %12 : vector<3x128x128xf32>
    %c0_14 = arith.constant 0 : index
    %c0_15 = arith.constant 0 : index
    %c0_16 = arith.constant 0 : index
    %14 = vector.load %arg2[%c0_14, %c0_15, %c0_16] : memref<3x16x128xbf16, #tpu.memory_space<vmem>>, vector<3x16x128xbf16>
    %15 = arith.extf %14 : vector<3x16x128xbf16> to vector<3x16x128xf32>
    %16 = vector.shape_cast %5 : vector<3x128xf32> to vector<3x1x128xf32>
    %17 = vector.broadcast %16 : vector<3x1x128xf32> to vector<3x16x128xf32>
    %18 = arith.addf %15, %17 : vector<3x16x128xf32>
    %19 = arith.truncf %18 : vector<3x16x128xf32> to vector<3x16x128xbf16>
    %20 = arith.truncf %13 : vector<3x128x128xf32> to vector<3x128x128xbf16>
    "tpu.trace_start"() <{level = 10 : i32, message = "nbd,ndc->nbc"}> : () -> ()
    %cst_17 = arith.constant dense<0.000000e+00> : vector<3x16x128xf32>
    %21 = tpu.matmul %19, %20, %cst_17 {dimension_numbers = #tpu.dot_dimension_numbers<[2], [1], [1], [2], [0, 0, 0, 1, 1, 2], [0], [0]>} : vector<3x16x128xbf16>, vector<3x128x128xbf16>, vector<3x16x128xf32> -> vector<3x16x128xf32>
    "tpu.trace_stop"() : () -> ()
    %c0_18 = arith.constant 0 : index
    %c0_19 = arith.constant 0 : index
    %c0_20 = arith.constant 0 : index
    %22 = vector.load %arg6[%c0_18, %c0_19, %c0_20] : memref<3x16x128xf32, #tpu.memory_space<vmem>>, vector<3x16x128xf32>
    tpu.vector_store %arg6[%c0_18, %c0_19, %c0_20], %21 {strides = array<i32>} : memref<3x16x128xf32, #tpu.memory_space<vmem>>, vector<3x16x128xf32>,
    return
  }
}

module attributes {stable_mosaic.version = 11 : i64} {
  func.func @_head_bwd_kernel(%arg0: memref<3x16x128xf32, #tpu.memory_space<vmem>>, %arg1: memref<3x16x128xbf16, #tpu.memory_space<vmem>>, %arg2: memref<128x128xf32, #tpu.memory_space<vmem>>, %arg3: memref<3x128xf32, #tpu.memory_space<vmem>>, %arg4: memref<3x128xf32, #tpu.memory_space<vmem>>, %arg5: memref<128x128xbf16, #tpu.memory_space<vmem>>, %arg6: memref<128x128xbf16, #tpu.memory_space<vmem>>, %arg7: memref<3x128xf32, #tpu.memory_space<vmem>>, %arg8: memref<3x128xf32, #tpu.memory_space<vmem>>) attributes {dimension_semantics = [], scalar_prefetch = 0 : i64, scratch_operands = 0 : i64, tpu.core_type = #tpu.core_type<tc>} {
    %c0 = arith.constant 0 : index
    %c0_0 = arith.constant 0 : index
    %c0_1 = arith.constant 0 : index
    %0 = vector.load %arg0[%c0, %c0_0, %c0_1] : memref<3x16x128xf32, #tpu.memory_space<vmem>>, vector<3x16x128xf32>
    %c0_2 = arith.constant 0 : index
    %c0_3 = arith.constant 0 : index
    %c0_4 = arith.constant 0 : index
    %1 = vector.load %arg1[%c0_2, %c0_3, %c0_4] : memref<3x16x128xbf16, #tpu.memory_space<vmem>>, vector<3x16x128xbf16>
    %2 = arith.extf %1 : vector<3x16x128xbf16> to vector<3x16x128xf32>
    %c0_5 = arith.constant 0 : index
    %c0_6 = arith.constant 0 : index
    %3 = vector.load %arg4[%c0_5, %c0_6] : memref<3x128xf32, #tpu.memory_space<vmem>>, vector<3x128xf32>
    %4 = vector.shape_cast %3 : vector<3x128xf32> to vector<3x1x128xf32>
    %5 = vector.broadcast %4 : vector<3x1x128xf32> to vector<3x16x128xf32>
    %6 = arith.addf %2, %5 : vector<3x16x128xf32>
    %c0_7 = arith.constant 0 : index
    %c0_8 = arith.constant 0 : index
    %7 = vector.load %arg2[%c0_7, %c0_8] : memref<128x128xf32, #tpu.memory_space<vmem>>, vector<128x128xf32>
    %8 = vector.shape_cast %7 : vector<128x128xf32> to vector<1x128x128xf32>
    %c0_9 = arith.constant 0 : index
    %c0_10 = arith.constant 0 : index
    %9 = vector.load %arg3[%c0_9, %c0_10] : memref<3x128xf32, #tpu.memory_space<vmem>>, vector<3x128xf32>
    %10 = vector.shape_cast %9 : vector<3x128xf32> to vector<3x1x128xf32>
    %11 = vector.broadcast %8 : vector<1x128x128xf32> to vector<3x128x128xf32>
    %12 = vector.broadcast %10 : vector<3x1x128xf32> to vector<3x128x128xf32>
    %13 = arith.addf %11, %12 : vector<3x128x128xf32>
    %cst = arith.constant dense<0.000000e+00> : vector<3x16xf32>
    %14 = vector.multi_reduction <add>, %0, %cst [2] : vector<3x16x128xf32> to vector<3x16xf32>
    %15 = vector.shape_cast %14 : vector<3x16xf32> to vector<3x16x1xf32>
    %16 = vector.broadcast %15 : vector<3x16x1xf32> to vector<3x16x128xf32>
    %17 = arith.mulf %16, %6 : vector<3x16x128xf32>
    %cst_11 = arith.constant dense<0.000000e+00> : vector<3x128xf32>
    %18 = vector.multi_reduction <add>, %17, %cst_11 [1] : vector<3x16x128xf32> to vector<3x128xf32>
    %cst_12 = arith.constant dense<0.000000e+00> : vector<3x128xf32>
    %19 = vector.multi_reduction <add>, %0, %cst_12 [1] : vector<3x16x128xf32> to vector<3x128xf32>
    %20 = vector.shape_cast %19 : vector<3x128xf32> to vector<3x128x1xf32>
    %21 = vector.broadcast %20 : vector<3x128x1xf32> to vector<3x128x128xf32>
    %22 = arith.mulf %21, %13 : vector<3x128x128xf32>
    %cst_13 = arith.constant dense<0.000000e+00> : vector<3x128xf32>
    %23 = vector.multi_reduction <add>, %22, %cst_13 [1] : vector<3x128x128xf32> to vector<3x128xf32>
    %24 = arith.truncf %18 : vector<3x128xf32> to vector<3x128xbf16>
    %c0_14 = arith.constant 0 : index
    %c0_15 = arith.constant 0 : index
    %25 = vector.load %arg5[%c0_14, %c0_15] : memref<128x128xbf16, #tpu.memory_space<vmem>>, vector<128x128xbf16>
    %cst_16 = arith.constant dense<0.000000e+00> : vector<3x128xf32>
    %26 = tpu.matmul %24, %25, %cst_16 {dimension_numbers = #tpu.dot_dimension_numbers<[1], [0], [0], [1], [0, 0, 1, 1], [], []>} : vector<3x128xbf16>, vector<128x128xbf16>, vector<3x128xf32> -> vector<3x128xf32>
    %c0_17 = arith.constant 0 : index
    %c0_18 = arith.constant 0 : index
    %27 = vector.load %arg7[%c0_17, %c0_18] : memref<3x128xf32, #tpu.memory_space<vmem>>, vector<3x128xf32>
    tpu.vector_store %arg7[%c0_17, %c0_18], %26 {strides = array<i32>} : memref<3x128xf32, #tpu.memory_space<vmem>>, vector<3x128xf32>,
    %28 = arith.truncf %23 : vector<3x128xf32> to vector<3x128xbf16>
    %c0_19 = arith.constant 0 : index
    %c0_20 = arith.constant 0 : index
    %29 = vector.load %arg6[%c0_19, %c0_20] : memref<128x128xbf16, #tpu.memory_space<vmem>>, vector<128x128xbf16>
    %cst_21 = arith.constant dense<0.000000e+00> : vector<3x128xf32>
    %30 = tpu.matmul %28, %29, %cst_21 {dimension_numbers = #tpu.dot_dimension_numbers<[1], [0], [0], [1], [0, 0, 1, 1], [], []>} : vector<3x128xbf16>, vector<128x128xbf16>, vector<3x128xf32> -> vector<3x128xf32>
    %c0_22 = arith.constant 0 : index
    %c0_23 = arith.constant 0 : index
    %31 = vector.load %arg8[%c0_22, %c0_23] : memref<3x128xf32, #tpu.memory_space<vmem>>, vector<3x128xf32>
    tpu.vector_store %arg8[%c0_22, %c0_23], %30 {strides = array<i32>} : memref<3x128xf32, #tpu.memory_space<vmem>>, vector<3x128xf32>,
    return
  }
}

module attributes {stable_mosaic.version = 11 : i64} {
  func.func @_head_fwd_kernel(%arg0: memref<3x128xbf16, #tpu.memory_space<vmem>>, %arg1: memref<3x128xbf16, #tpu.memory_space<vmem>>, %arg2: memref<3x16x128xbf16, #tpu.memory_space<vmem>>, %arg3: memref<128x128xf32, #tpu.memory_space<vmem>>, %arg4: memref<128x128xbf16, #tpu.memory_space<vmem>>, %arg5: memref<128x128xbf16, #tpu.memory_space<vmem>>, %arg6: memref<3x16x128xf32, #tpu.memory_space<vmem>>, %arg7: memref<3x128xf32, #tpu.memory_space<vmem>>, %arg8: memref<3x128xf32, #tpu.memory_space<vmem>>) attributes {dimension_semantics = [], scalar_prefetch = 0 : i64, scratch_operands = 0 : i64, tpu.core_type = #tpu.core_type<tc>} {
    %c0 = arith.constant 0 : index
    %c0_0 = arith.constant 0 : index
    %0 = vector.load %arg0[%c0, %c0_0] : memref<3x128xbf16, #tpu.memory_space<vmem>>, vector<3x128xbf16>
    %c0_1 = arith.constant 0 : index
    %c0_2 = arith.constant 0 : index
    %1 = vector.load %arg4[%c0_1, %c0_2] : memref<128x128xbf16, #tpu.memory_space<vmem>>, vector<128x128xbf16>
    %cst = arith.constant dense<0.000000e+00> : vector<3x128xf32>
    %2 = tpu.matmul %0, %1, %cst {dimension_numbers = #tpu.dot_dimension_numbers<[1], [0], [0], [1], [0, 0, 1, 1], [], []>} : vector<3x128xbf16>, vector<128x128xbf16>, vector<3x128xf32> -> vector<3x128xf32>
    %c0_3 = arith.constant 0 : index
    %c0_4 = arith.constant 0 : index
    %3 = vector.load %arg1[%c0_3, %c0_4] : memref<3x128xbf16, #tpu.memory_space<vmem>>, vector<3x128xbf16>
    %c0_5 = arith.constant 0 : index
    %c0_6 = arith.constant 0 : index
    %4 = vector.load %arg5[%c0_5, %c0_6] : memref<128x128xbf16, #tpu.memory_space<vmem>>, vector<128x128xbf16>
    %cst_7 = arith.constant dense<0.000000e+00> : vector<3x128xf32>
    %5 = tpu.matmul %3, %4, %cst_7 {dimension_numbers = #tpu.dot_dimension_numbers<[1], [0], [0], [1], [0, 0, 1, 1], [], []>} : vector<3x128xbf16>, vector<128x128xbf16>, vector<3x128xf32> -> vector<3x128xf32>
    %c0_8 = arith.constant 0 : index
    %c0_9 = arith.constant 0 : index
    %6 = vector.load %arg7[%c0_8, %c0_9] : memref<3x128xf32, #tpu.memory_space<vmem>>, vector<3x128xf32>
    tpu.vector_store %arg7[%c0_8, %c0_9], %2 {strides = array<i32>} : memref<3x128xf32, #tpu.memory_space<vmem>>, vector<3x128xf32>,
    %c0_10 = arith.constant 0 : index
    %c0_11 = arith.constant 0 : index
    %7 = vector.load %arg8[%c0_10, %c0_11] : memref<3x128xf32, #tpu.memory_space<vmem>>, vector<3x128xf32>
    tpu.vector_store %arg8[%c0_10, %c0_11], %5 {strides = array<i32>} : memref<3x128xf32, #tpu.memory_space<vmem>>, vector<3x128xf32>,
    %c0_12 = arith.constant 0 : index
    %c0_13 = arith.constant 0 : index
    %8 = vector.load %arg3[%c0_12, %c0_13] : memref<128x128xf32, #tpu.memory_space<vmem>>, vector<128x128xf32>
    %9 = vector.shape_cast %8 : vector<128x128xf32> to vector<1x128x128xf32>
    %10 = vector.shape_cast %2 : vector<3x128xf32> to vector<3x128x1xf32>
    %11 = vector.broadcast %9 : vector<1x128x128xf32> to vector<3x128x128xf32>
    %12 = vector.broadcast %10 : vector<3x128x1xf32> to vector<3x128x128xf32>
    %13 = arith.addf %11, %12 : vector<3x128x128xf32>
    %c0_14 = arith.constant 0 : index
    %c0_15 = arith.constant 0 : index
    %c0_16 = arith.constant 0 : index
    %14 = vector.load %arg2[%c0_14, %c0_15, %c0_16] : memref<3x16x128xbf16, #tpu.memory_space<vmem>>, vector<3x16x128xbf16>
    %15 = arith.extf %14 : vector<3x16x128xbf16> to vector<3x16x128xf32>
    %16 = vector.shape_cast %5 : vector<3x128xf32> to vector<3x1x128xf32>
    %17 = vector.broadcast %16 : vector<3x1x128xf32> to vector<3x16x128xf32>
    %18 = arith.addf %15, %17 : vector<3x16x128xf32>
    %19 = arith.truncf %18 : vector<3x16x128xf32> to vector<3x16x128xbf16>
    %20 = arith.truncf %13 : vector<3x128x128xf32> to vector<3x128x128xbf16>
    "tpu.trace_start"() <{level = 10 : i32, message = "nbd,ndc->nbc"}> : () -> ()
    %cst_17 = arith.constant dense<0.000000e+00> : vector<3x16x128xf32>
    %21 = tpu.matmul %19, %20, %cst_17 {dimension_numbers = #tpu.dot_dimension_numbers<[2], [1], [1], [2], [0, 0, 0, 1, 1, 2], [0], [0]>} : vector<3x16x128xbf16>, vector<3x128x128xbf16>, vector<3x16x128xf32> -> vector<3x16x128xf32>
    "tpu.trace_stop"() : () -> ()
    %c0_18 = arith.constant 0 : index
    %c0_19 = arith.constant 0 : index
    %c0_20 = arith.constant 0 : index
    %22 = vector.load %arg6[%c0_18, %c0_19, %c0_20] : memref<3x16x128xf32, #tpu.memory_space<vmem>>, vector<3x16x128xf32>
    tpu.vector_store %arg6[%c0_18, %c0_19, %c0_20], %21 {strides = array<i32>} : memref<3x16x128xf32, #tpu.memory_space<vmem>>, vector<3x16x128xf32>,
    return
  }
}

</mosaic_0001>

<bundles_post_ra>
// kernel: _meta_forward.2
= control target key start
LH: loop header
LB: loop body
LE: loop exit
PB: predicated region body
PF: predicated region fallthrough
CT: control target
= control target key end

     0   :  { %s796_s9 = smov 0   ;;  %s798_s10 = smov 0   ;;  %s908_s0 = inlined_call_operand.vmem [shape: bf16[16,1024], index: 0, kind: input, shape index: {}]   ;;  %s909_s1 = inlined_call_operand.vmem [shape: bf16[1024,128], index: 1, kind: input, shape index: {}]   ;;  %s910_s2 = inlined_call_operand.vmem [shape: f32[16,128], index: 2, kind: output, shape index: {}]  }
   0x1   :  { %s800_s11 = smov 0  }
   0x2 LB: > { %s599_s12 = sadd.s32 4294967295, %s778_s11   ;;  %s813_s13 = sadd.s32 1, %s778_s11   ;;  %s778_s11 = sphi %s800_s11, %s913_s11   ;;  %s774_s10 = sphi %s798_s10, %s912_s10   ;;  %s770_s9 = sphi %s796_s9, %s911_s9  }
   0x3   : > { %s16_s14 = ssub.s32 %s778_s11, %s813_s13  ;;  %s19_s15 = sadd.s32 1, %s774_s10 }
   0x4   : > { %p17_p0 = scmp.eq.s32.totalorder %s16_s14, 0  ;;  %p26_p1 = scmp.ne.s32.totalorder %s774_s10, %s770_s9 }
   0x5   : > { %p27_p2 = scmp.eq.s32.totalorder %s778_s11, 0  ;;  %p601_p4 = scmp.ge.s32.totalorder %s778_s11, 2 }
   0x6   : > { %s822_s16 = scalar_select %p17_p0, %s774_s10, %s19_s15  }
   0x7   : > { %p28_p3 = por %p27_p2, %p26_p1  ;;  %99 = sbr.rel (%p601_p4) target bundleno = 21 (0x15), region = 16 }
   0xe   : > { %102 = sbr.rel (!%p28_p3) target bundleno = 21 (0x15), region = 20  ;;  %s104_s17 = sand.u32 (%p28_p3), 1, %s774_s10  }
   0xf   : > { %s648_s18 = sshll.u32 (%p28_p3), %s778_s11, 4  ;;  %s602_s19 = sshll.u32 (%p28_p3), %s104_s17, 5 }
  0x10   : > { %s109_s22 = scalar_lea.vmem (%p28_p3), %s908_s0, %s648_s18  ;;  %s106_s23 = scalar_lea.vmem (%p28_p3), [#allocation2], %s602_s19 }
  0x11   : > { %v122_v0 = vld [vmem:[%s109_s22] sm:$0xff] (%p28_p3)  ;;  %v124_v1 = vld [vmem:[%s109_s22 + $0x8] sm:$0xff] (%p28_p3) }
  0x12   : > { %v126_v2 = vld [vmem:[%s109_s22 + $0x20] sm:$0xff] (%p28_p3)  ;;  %123 = vst [vmem:[%s106_s23] sm:$0xff] (%p28_p3), %v122_v0  ;;  %125 = vst [vmem:[%s106_s23 + $0x8] sm:$0xff] (%p28_p3), %v124_v1  ;;  %v128_v3 = vld [vmem:[%s109_s22 + $0x28] sm:$0xff] (%p28_p3) }
  0x13   : > { %127 = vst [vmem:[%s106_s23 + $0x10] sm:$0xff] (%p28_p3), %v126_v2  ;;  %129 = vst [vmem:[%s106_s23 + $0x18] sm:$0xff] (%p28_p3), %v128_v3 }
  0x15 PF: > { %p605_p5 = scmp.ge.s32.totalorder %s778_s11, 1  ;;  %p143_p6 = scmp.lt.s32.totalorder %s778_s11, 3 }
  0x17   : > { %p144_p7 = pnand %p605_p5, %p143_p6 }
  0x18   : > { %s150_s24 = sand.u32 (!%p144_p7), 1, %s770_s9   ;;  %s607_s25 = sshll.u32 (!%p144_p7), %s599_s12, 6 }
  0x19   : > { %147 = sbr.rel (%p144_p7) target bundleno = 296 (0x128), region = 47  ;;  %s606_s26 = sshll.u32 (!%p144_p7), %s150_s24, 5 }
  0x1a   : > { %p173_p8 = scmp.lt.s32.totalorder (!%p144_p7), %s607_s25, 127  ;;  %s840_s3 = scalar_lea.vmem (!%p144_p7), [#allocation2], %s606_s26 }
  0x1b   : > { %p609_p9 = scmp.ne.s32.totalorder (!%p144_p7), %s599_s12, 0 }
  0x20   : > { %s915_s25 = smov (!%p173_p8, %s607_s25), 127  ;;  %182 = sbr.rel (%p609_p9) target bundleno = 39 (0x27), region = 55 }
  0x21   : > { %s608_s27 = sshll.u32 %s915_s25, 2  ;;  %v780_v4 = vmov (!%p609_p9), 0.0  }
  0x22   : > { %s838_s30 = scalar_lea.vmem %s909_s1, %s608_s27  ;;  %183 = vst [vmem:[%s910_s2] sm:$0xff] (!%p609_p9), %v780_v4  ;;  %184 = vst [vmem:[%s910_s2 + $0x8] sm:$0xff] (!%p609_p9), %v780_v4 }
  0x27 PF: > { %v718_v5 = vld [vmem:[%s838_s30 + $0x40] sm:$0xff]   ;;  %v722_v9 = vld [vmem:[%s838_s30 + $0x48] sm:$0xff]   ;;  %v726_v13 = vld [vmem:[%s838_s30 + $0x50] sm:$0xff]  }
  0x28   : > { %v719_v6 = vld [vmem:[%s838_s30 + $0xc0] sm:$0xff]   ;;  %649 = vmatprep.subr.bf16.mxu0 %v718_v5  ;;  %v723_v10 = vld [vmem:[%s838_s30 + $0xc8] sm:$0xff]   ;;  %v727_v14 = vld [vmem:[%s838_s30 + $0xd0] sm:$0xff]  }
  0x29   : > { %v720_v7 = vld [vmem:[%s838_s30] sm:$0xff]   ;;  %671 = vmatprep.subr.bf16.mxu1 %v719_v6  ;;  %v724_v11 = vld [vmem:[%s838_s30 + $0x8] sm:$0xff]   ;;  %v728_v15 = vld [vmem:[%s838_s30 + $0x10] sm:$0xff]  }
  0x2a   : > { %v721_v8 = vld [vmem:[%s838_s30 + $0x80] sm:$0xff]   ;;  %650 = vmatpush3.bf16.msra.mxu0 %v720_v7  ;;  %v725_v12 = vld [vmem:[%s838_s30 + $0x88] sm:$0xff]   ;;  %v729_v16 = vld [vmem:[%s838_s30 + $0x90] sm:$0xff]  }
  0x2b   : > { %672 = vmatpush3.bf16.msra.mxu1 %v721_v8  ;;  %651 = vmatprep.subr.bf16.mxu0 %v722_v9  ;;  %v730_v17 = vld [vmem:[%s838_s30 + $0x58] sm:$0xff]   ;;  %v734_v21 = vld [vmem:[%s838_s30 + $0x60] sm:$0xff]   ;;  %v738_v25 = vld [vmem:[%s838_s30 + $0x68] sm:$0xff]  }
  0x2c   : > { %673 = vmatprep.subr.bf16.mxu1 %v723_v10  ;;  %v731_v18 = vld [vmem:[%s838_s30 + $0xd8] sm:$0xff]   ;;  %v735_v22 = vld [vmem:[%s838_s30 + $0xe0] sm:$0xff]   ;;  %v739_v26 = vld [vmem:[%s838_s30 + $0xe8] sm:$0xff]  }
  0x2d   : > { %v732_v19 = vld [vmem:[%s838_s30 + $0x18] sm:$0xff]   ;;  %v736_v23 = vld [vmem:[%s838_s30 + $0x20] sm:$0xff]   ;;  %v740_v27 = vld [vmem:[%s838_s30 + $0x28] sm:$0xff]  }
  0x2e   : > { %652 = vmatpush3.bf16.msra.mxu0 %v724_v11  ;;  %v733_v20 = vld [vmem:[%s838_s30 + $0x98] sm:$0xff]   ;;  %v737_v24 = vld [vmem:[%s838_s30 + $0xa0] sm:$0xff]   ;;  %v741_v28 = vld [vmem:[%s838_s30 + $0xa8] sm:$0xff]  }
  0x2f   : > { %674 = vmatpush3.bf16.msra.mxu1 %v725_v12  ;;  %653 = vmatprep.subr.bf16.mxu0 %v726_v13  ;;  %v742_v29 = vld [vmem:[%s838_s30 + $0x70] sm:$0xff]   ;;  %v746_v33 = vld [vmem:[%s838_s30 + $0x78] sm:$0xff]   ;;  %v185_v50 = vld [vmem:[%s910_s2] sm:$0xff] }
  0x30   : > { %675 = vmatprep.subr.bf16.mxu1 %v727_v14  ;;  %v743_v30 = vld [vmem:[%s838_s30 + $0xf0] sm:$0xff]   ;;  %v747_v34 = vld [vmem:[%s838_s30 + $0xf8] sm:$0xff]   ;;  %v186_v55 = vld [vmem:[%s910_s2 + $0x8] sm:$0xff] }
  0x31   : > { %v744_v31 = vld [vmem:[%s838_s30 + $0x30] sm:$0xff]   ;;  %v748_v35 = vld [vmem:[%s838_s30 + $0x38] sm:$0xff]  }
  0x32   : > { %654 = vmatpush3.bf16.msra.mxu0 %v728_v15  ;;  %v745_v32 = vld [vmem:[%s838_s30 + $0xb0] sm:$0xff]   ;;  %v749_v36 = vld [vmem:[%s838_s30 + $0xb8] sm:$0xff]  }
  0x33   : > { %676 = vmatpush3.bf16.msra.mxu1 %v729_v16  ;;  %655 = vmatprep.subr.bf16.mxu0 %v730_v17  ;;  %v750_v37 = vld [vmem:[%s840_s3] ss:$16 sps:$4 sm:$0xff]   ;;  %v752_v38 = vld [vmem:[%s840_s3 + $0x4] ss:$16 sps:$4 sm:$0xff]   ;;  %v753_v39 = vld [vmem:[%s840_s3 + $0x8] ss:$16 sps:$4 sm:$0xff]  }
  0x34   : > { %677 = vmatprep.subr.bf16.mxu1 %v731_v18  ;;  %v755_v40 = vld [vmem:[%s840_s3 + $0xc] ss:$16 sps:$4 sm:$0xff]   ;;  %499 = vmatprep.mubr.bf16.mxu0 %v752_v38 }
  0x35   : > { %540 = vmatprep.mubr.bf16.mxu1 %v755_v40 }
  0x36   : > { %656 = vmatpush3.bf16.msra.mxu0 %v732_v19 }
  0x37   : > { %678 = vmatpush3.bf16.msra.mxu1 %v733_v20  ;;  %657 = vmatprep.subr.bf16.mxu0 %v734_v21 }
  0x38   : > { %679 = vmatprep.subr.bf16.mxu1 %v735_v22 }
  0x3a   : > { %658 = vmatpush3.bf16.msra.mxu0 %v736_v23 }
  0x3b   : > { %680 = vmatpush3.bf16.msra.mxu1 %v737_v24  ;;  %659 = vmatprep.subr.bf16.mxu0 %v738_v25 }
  0x3c   : > { %681 = vmatprep.subr.bf16.mxu1 %v739_v26 }
  0x3e   : > { %660 = vmatpush3.bf16.msra.mxu0 %v740_v27 }
  0x3f   : > { %682 = vmatpush3.bf16.msra.mxu1 %v741_v28  ;;  %661 = vmatprep.subr.bf16.mxu0 %v742_v29 }
  0x40   : > { %683 = vmatprep.subr.bf16.mxu1 %v743_v30 }
  0x42   : > { %662 = vmatpush3.bf16.msra.mxu0 %v744_v31 }
  0x43   : > { %684 = vmatpush3.bf16.msra.mxu1 %v745_v32  ;;  %663 = vmatprep.subr.bf16.mxu0 %v746_v33 }
  0x44   : > { %685 = vmatprep.subr.bf16.mxu1 %v747_v34 }
  0x46   : > { %664 = vmatpush3.bf16.msra.mxu0 %v748_v35 }
  0x47   : > { %686 = vmatpush3.bf16.msra.mxu1 %v749_v36 }
  0x49   : > { %500 = vmatmul.mubr.bf16.vlgmr.msra.gmra.mrb[0].mxu0 %v750_v37 }
  0x4a   : > { %541 = vmatmul.mubr.bf16.vlgmr.msra.gmra.mrb[0].mxu1 %v753_v39 }
 0x11c   : > { %v665_v41 = vpop.f32.mrb[0].mxu0 }
 0x11d   : > { %v687_v42 = vpop.f32.mrb[0].mxu1  ;;  %v666_v43 = vpop.f32.mrb[1].mxu0 }
 0x11e   : > { %v667_v44 = vadd.f32 %v666_v43, %v665_v41  ;;  %v688_v45 = vpop.f32.mrb[1].mxu1  ;;  %v668_v46 = vpop.f32.mrb[2].mxu0 }
 0x11f   : > { %v689_v47 = vadd.f32 %v688_v45, %v687_v42  ;;  %v690_v48 = vpop.f32.mrb[2].mxu1  ;;  %v669_v49 = vpop.f32.mrb[3].mxu0 }
 0x120   : > { %v670_v51 = vadd.f32 %v669_v49, %v668_v46  ;;  %v691_v52 = vpop.f32.mrb[3].mxu1 }
 0x121   : > { %v543_v53 = vadd.f32 %v689_v47, %v667_v44  ;;  %v692_v54 = vadd.f32 %v691_v52, %v690_v48 }
 0x123   : > { %v549_v56 = vadd.f32 %v543_v53, %v185_v50  ;;  %v546_v57 = vadd.f32 %v692_v54, %v670_v51 }
 0x125   : > { %551 = vst [vmem:[%s910_s2] sm:$0xff] %v549_v56  ;;  %v550_v58 = vadd.f32 %v546_v57, %v186_v55 }
 0x127   : > { %552 = vst [vmem:[%s910_s2 + $0x8] sm:$0xff] %v550_v58 }
 0x128 PF: > { %p9_p10 = scmp.ge.s32.totalorder %s813_s13, 4   ;;  %s911_s9 = smov %s774_s10 }
 0x129   : > { %s912_s10 = smov %s822_s16  ;;  %s913_s11 = smov %s813_s13 }
 0x12a   :  { %11 = sbr.rel (!%p9_p10) target bundleno = 2 (0x2), region = 89 }

// kernel: jvp__.2
= control target key start
LH: loop header
LB: loop body
LE: loop exit
PB: predicated region body
PF: predicated region fallthrough
CT: control target
= control target key end

     0   :  { %v923_v0 = vmov 0.0   ;;  %vm924_vm0 = vmmov 0   ;;  %v255_v19 = vlaneseq  ;;  %v925_v27 = vmov 1966171168   ;;  %s1248_s4 = inlined_call_operand.vmem [shape: bf16[128,128], index: 4, kind: input, shape index: {}]   ;;  %s1249_s5 = inlined_call_operand.vmem [shape: bf16[128,128], index: 5, kind: input, shape index: {}]   ;;  %s1250_s0 = inlined_call_operand.vmem [shape: bf16[3,128], index: 0, kind: input, shape index: {}]   ;;  %s1251_s1 = inlined_call_operand.vmem [shape: bf16[3,128], index: 1, kind: input, shape index: {}]   ;;  %s1252_s7 = inlined_call_operand.vmem [shape: f32[3,128], index: 7, kind: output, shape index: {1}]   ;;  %s1253_s8 = inlined_call_operand.vmem [shape: f32[3,128], index: 8, kind: output, shape index: {2}]   ;;  %s1254_s3 = inlined_call_operand.vmem [shape: f32[128,128], index: 3, kind: input, shape index: {}]   ;;  %s1255_s2 = inlined_call_operand.vmem [shape: bf16[3,16,128], index: 2, kind: input, shape index: {}]   ;;  %s1256_s6 = inlined_call_operand.vmem [shape: f32[3,16,128], index: 6, kind: output, shape index: {0}]  }
   0x1   :  { %804 = vmatprep.subr.bf16.mxu0 %v923_v0  ;;  %v907_v1 = vld [vmem:[%s1248_s4] sm:$0xff]   ;;  %820 = vmatprep.mubr.msk.bf16.mxu0 %vm924_vm0, %v923_v0  ;;  %v908_v2 = vld [vmem:[%s1248_s4 + $0x8] sm:$0xff]   ;;  %v909_v3 = vld [vmem:[%s1248_s4 + $0x10] sm:$0xff]   ;;  %v518_v28 = vunpack.c.l.s4 %v925_v27 }
   0x2   :  { %824 = vmatprep.subr.bf16.mxu1 %v923_v0  ;;  %840 = vmatprep.mubr.msk.bf16.mxu1 %vm924_vm0, %v923_v0  ;;  %v915_v4 = vld [vmem:[%s1249_s5] sm:$0xff]   ;;  %v910_v5 = vld [vmem:[%s1248_s4 + $0x18] sm:$0xff]   ;;  %v916_v6 = vld [vmem:[%s1249_s5 + $0x8] sm:$0xff]   ;;  %v256_v20 = vshrl.u32 %v255_v19, 7 }
   0x3   :  { %805 = vmatpush3.bf16.msra.mxu0 %v907_v1  ;;  %825 = vmatpush3.bf16.msra.mxu1 %v915_v4  ;;  %v911_v7 = vld [vmem:[%s1248_s4 + $0x20] sm:$0xff]   ;;  %v917_v8 = vld [vmem:[%s1249_s5 + $0x10] sm:$0xff]   ;;  %v912_v9 = vld [vmem:[%s1248_s4 + $0x28] sm:$0xff]   ;;  %v519_v29 = vunpack.c.0.s8 %v518_v28 }
   0x4   :  { %806 = vmatprep.subr.bf16.mxu0 %v923_v0  ;;  %826 = vmatprep.subr.bf16.mxu1 %v923_v0  ;;  %v918_v10 = vld [vmem:[%s1249_s5 + $0x18] sm:$0xff]   ;;  %v913_v11 = vld [vmem:[%s1248_s4 + $0x30] sm:$0xff]   ;;  %v919_v12 = vld [vmem:[%s1249_s5 + $0x20] sm:$0xff]   ;;  %v257_v21 = vsub.s32 0, %v256_v20  ;;  %v324_v43 = vsub.s32 1, %v256_v20  ;;  %v391_v45 = vsub.s32 2, %v256_v20 }
   0x5   :  { %v914_v13 = vld [vmem:[%s1248_s4 + $0x38] sm:$0xff]   ;;  %v920_v14 = vld [vmem:[%s1249_s5 + $0x28] sm:$0xff]   ;;  %v27_v15 = vld [vmem:[%s1250_s0] sm:$0x3]  ;;  %v522_v30 = vsub.s32 %v519_v29, %v256_v20 }
   0x6   :  { %v921_v16 = vld [vmem:[%s1249_s5 + $0x30] sm:$0xff]   ;;  %v922_v17 = vld [vmem:[%s1249_s5 + $0x38] sm:$0xff]   ;;  %v132_v18 = vld [vmem:[%s1251_s1] sm:$0x3] }
   0x7   :  { %807 = vmatpush3.bf16.msra.mxu0 %v908_v2  ;;  %827 = vmatpush3.bf16.msra.mxu1 %v916_v6  ;;  %v1066_v49 = vld [vmem:[%s1254_s3] sm:$0xff]  ;;  %v1071_v50 = vld [vmem:[%s1254_s3 + $0x8] sm:$0xff]  ;;  %v1076_v51 = vld [vmem:[%s1254_s3 + $0x18] sm:$0xff] }
   0x8   :  { %808 = vmatprep.subr.bf16.mxu0 %v923_v0  ;;  %828 = vmatprep.subr.bf16.mxu1 %v923_v0  ;;  %v1083_v56 = vld [vmem:[%s1254_s3 + $0x10] sm:$0xff]  ;;  %v1089_v59 = vld [vmem:[%s1254_s3 + $0x28] sm:$0xff]  ;;  %v1094_v61 = vld [vmem:[%s1254_s3 + $0x20] sm:$0xff] }
   0x9   :  { %v1103_v4 = vld [vmem:[%s1254_s3 + $0x38] sm:$0xff]  ;;  %v1108_v6 = vld [vmem:[%s1254_s3 + $0x30] sm:$0xff]  ;;  %v1147_v27 = vld [vmem:[%s1254_s3 + $0x60] sm:$0xff] }
   0xa   :  { %v1134_v20 = vld [vmem:[%s1254_s3 + $0x50] sm:$0xff]  ;;  %v746_v29 = vld [vmem:[%s1255_s2] sm:$0xff]  }
   0xb   :  { %809 = vmatpush3.bf16.msra.mxu0 %v909_v3  ;;  %829 = vmatpush3.bf16.msra.mxu1 %v917_v8 }
   0xc   :  { %810 = vmatprep.subr.bf16.mxu0 %v923_v0  ;;  %830 = vmatprep.subr.bf16.mxu1 %v923_v0 }
   0xf   :  { %811 = vmatpush3.bf16.msra.mxu0 %v910_v5  ;;  %831 = vmatpush3.bf16.msra.mxu1 %v918_v10 }
  0x10   :  { %812 = vmatprep.subr.bf16.mxu0 %v923_v0  ;;  %832 = vmatprep.subr.bf16.mxu1 %v923_v0 }
  0x13   :  { %813 = vmatpush3.bf16.msra.mxu0 %v911_v7  ;;  %833 = vmatpush3.bf16.msra.mxu1 %v919_v12 }
  0x14   :  { %814 = vmatprep.subr.bf16.mxu0 %v923_v0  ;;  %834 = vmatprep.subr.bf16.mxu1 %v923_v0 }
  0x17   :  { %815 = vmatpush3.bf16.msra.mxu0 %v912_v9  ;;  %835 = vmatpush3.bf16.msra.mxu1 %v920_v14 }
  0x18   :  { %816 = vmatprep.subr.bf16.mxu0 %v923_v0  ;;  %836 = vmatprep.subr.bf16.mxu1 %v923_v0 }
  0x1b   :  { %817 = vmatpush3.bf16.msra.mxu0 %v913_v11  ;;  %837 = vmatpush3.bf16.msra.mxu1 %v921_v16  ;;  %v1116_v11 = vld [vmem:[%s1254_s3 + $0x48] sm:$0xff] }
  0x1c   :  { %818 = vmatprep.subr.bf16.mxu0 %v923_v0  ;;  %838 = vmatprep.subr.bf16.mxu1 %v923_v0 }
  0x1f   :  { %819 = vmatpush3.bf16.msra.mxu0 %v914_v13  ;;  %839 = vmatpush3.bf16.msra.mxu1 %v922_v17  ;;  %v1121_v13 = vld [vmem:[%s1254_s3 + $0x40] sm:$0xff] }
  0x20   :  { %844 = vmatprep.subr.bf16.mxu0 %v923_v0  ;;  %864 = vmatprep.subr.bf16.mxu1 %v923_v0 }
  0x22   :  { %821 = vmatmul.mubr.bf16.vlgmr.msra.gmra.mrb[0].mxu0 %v27_v15  ;;  %841 = vmatmul.mubr.bf16.vlgmr.msra.gmra.mrb[0].mxu1 %v132_v18  ;;  %v1129_v18 = vld [vmem:[%s1254_s3 + $0x58] sm:$0xff] }
  0x23   :  { %860 = vmatprep.mubr.msk.bf16.mxu0 %vm924_vm0, %v923_v0  ;;  %880 = vmatprep.mubr.msk.bf16.mxu1 %vm924_vm0, %v923_v0 }
  0xf5   :  { %v126_v22 = vpop.f32.mrb[0].mxu0  ;;  %v231_v31 = vpop.f32.mrb[0].mxu1 }
  0xf6   :  { %237 = vst [vmem:[%s1252_s7] sm:$0x7] %v126_v22  ;;  %v258_v23 = vrot.slane %v126_v22, %v257_v21  ;;  %v822_v24 = vpop.f32.mrb[1].mxu0  ;;  %v523_v32 = vrot.slane %v231_v31, %v522_v30  ;;  %v842_v33 = vpop.f32.mrb[1].mxu1  ;;  %238 = vst [vmem:[%s1253_s8] sm:$0x7] %v231_v31  ;;  %v325_v44 = vrot.slane %v126_v22, %v324_v43 }
  0xf7   :  { %v129_v25 = vpop.f32.mrb[2].mxu0  ;;  %v234_v34 = vpop.f32.mrb[2].mxu1  ;;  %v392_v46 = vrot.slane %v126_v22, %v391_v45  ;;  %v1158_v33 = vld [vmem:[%s1254_s3 + $0x78] sm:$0xff] }
  0xf8   :  { %268 = vbcast.lane.b32.xlu1 %v258_v23, 272  ;;  %260 = vbcast.lane.b32.xlu0 %v258_v23, 256  ;;  %v823_v26 = vpop.f32.mrb[3].mxu0  ;;  %v524_v35 = vcombine.high %v523_v32, %v523_v32  ;;  %v531_v36 = vrot.slane %v523_v32, %v522_v30  ;;  %v843_v37 = vpop.f32.mrb[3].mxu1  ;;  %v1142_v25 = vld [vmem:[%s1254_s3 + $0x68] sm:$0xff] }
  0xf9   :  { %v747_v37 = vunpack.c.l.bf16 %v746_v29 }
  0xfa   :  { %v538_v38 = vrot.slane %v524_v35, %v522_v30  ;;  %v539_v39 = vcombine.high %v531_v36, %v531_v36  ;;  %v1057_v40 = vrot.slane %v531_v36, %v257_v21  ;;  %v1163_v35 = vld [vmem:[%s1254_s3 + $0x70] sm:$0xff] }
  0xfc   :  { %272 = vbcast.lane.b32.xlu1 %v258_v23, 280  ;;  %264 = vbcast.lane.b32.xlu0 %v258_v23, 264  ;;  %v1059_v41 = vrot.slane %v538_v38, %v257_v21  ;;  %v1061_v42 = vrot.slane %v539_v39, %v257_v21  ;;  %v748_v38 = vunpack.c.h.bf16 %v746_v29  ;;  %v555_v45 = vadd.f32 %v747_v37, %v1057_v40 }
 0x100   :  { %280 = vbcast.lane.b32.xlu1 %v258_v23, 296  ;;  %276 = vbcast.lane.b32.xlu0 %v258_v23, 288 }
 0x104   :  { %288 = vbcast.lane.b32.xlu1 %v258_v23, 312  ;;  %284 = vbcast.lane.b32.xlu0 %v258_v23, 304 }
 0x108   :  { %296 = vbcast.lane.b32.xlu1 %v258_v23, 328  ;;  %292 = vbcast.lane.b32.xlu0 %v258_v23, 320 }
 0x10c   :  { %304 = vbcast.lane.b32.xlu1 %v258_v23, 344  ;;  %300 = vbcast.lane.b32.xlu0 %v258_v23, 336 }
 0x110   :  { %312 = vbcast.lane.b32.xlu1 %v258_v23, 360  ;;  %308 = vbcast.lane.b32.xlu0 %v258_v23, 352 }
 0x114   :  { %320 = vbcast.lane.b32.xlu1 %v258_v23, 376  ;;  %316 = vbcast.lane.b32.xlu0 %v258_v23, 368 }
 0x118   :  { %331 = vbcast.lane.b32.xlu1 %v325_v44, 264  ;;  %327 = vbcast.lane.b32.xlu0 %v325_v44, 256 }
 0x11c   :  { %398 = vbcast.lane.b32.xlu1 %v392_v46, 264  ;;  %394 = vbcast.lane.b32.xlu0 %v392_v46, 256 }
 0x120   :  { %339 = vbcast.lane.b32.xlu1 %v325_v44, 280  ;;  %335 = vbcast.lane.b32.xlu0 %v325_v44, 272 }
 0x124   :  { %406 = vbcast.lane.b32.xlu1 %v392_v46, 280  ;;  %402 = vbcast.lane.b32.xlu0 %v392_v46, 272 }
 0x128   :  { %347 = vbcast.lane.b32.xlu1 %v325_v44, 296  ;;  %343 = vbcast.lane.b32.xlu0 %v325_v44, 288 }
 0x12c   :  { %414 = vbcast.lane.b32.xlu1 %v392_v46, 296  ;;  %410 = vbcast.lane.b32.xlu0 %v392_v46, 288 }
 0x130   :  { %355 = vbcast.lane.b32.xlu1 %v325_v44, 312  ;;  %351 = vbcast.lane.b32.xlu0 %v325_v44, 304 }
 0x134   :  { %422 = vbcast.lane.b32.xlu1 %v392_v46, 312  ;;  %418 = vbcast.lane.b32.xlu0 %v392_v46, 304 }
 0x138   :  { %363 = vbcast.lane.b32.xlu1 %v325_v44, 328  ;;  %359 = vbcast.lane.b32.xlu0 %v325_v44, 320 }
 0x13c   :  { %430 = vbcast.lane.b32.xlu1 %v392_v46, 328  ;;  %426 = vbcast.lane.b32.xlu0 %v392_v46, 320 }
 0x140   :  { %371 = vbcast.lane.b32.xlu1 %v325_v44, 344  ;;  %367 = vbcast.lane.b32.xlu0 %v325_v44, 336 }
 0x144   :  { %438 = vbcast.lane.b32.xlu1 %v392_v46, 344  ;;  %434 = vbcast.lane.b32.xlu0 %v392_v46, 336 }
 0x148   :  { %379 = vbcast.lane.b32.xlu1 %v325_v44, 360  ;;  %375 = vbcast.lane.b32.xlu0 %v325_v44, 352 }
 0x14c   :  { %446 = vbcast.lane.b32.xlu1 %v392_v46, 360  ;;  %442 = vbcast.lane.b32.xlu0 %v392_v46, 352 }
 0x150   :  { %387 = vbcast.lane.b32.xlu1 %v325_v44, 376  ;;  %383 = vbcast.lane.b32.xlu0 %v325_v44, 368 }
 0x154   :  { %454 = vbcast.lane.b32.xlu1 %v392_v46, 376  ;;  %450 = vbcast.lane.b32.xlu0 %v392_v46, 368  ;;  %v556_v46 = vadd.f32 %v748_v38, %v1057_v40 }
 0x16a   :  { %v269_v47 = vpop.permute.xlu1 %268  ;;  %v261_v48 = vpop.permute.xlu0 %260 }
 0x16b   :  { %v456_v54 = vadd.f32 %v261_v48, %v1066_v49  ;;  %v458_v63 = vadd.f32 %v269_v47, %v1083_v56 }
 0x16e   :  { %v273_v52 = vpop.permute.xlu1 %272  ;;  %v265_v53 = vpop.permute.xlu0 %264 }
 0x16f   :  { %v457_v55 = vadd.f32 %v265_v53, %v1071_v50  ;;  %v459_v57 = vadd.f32 %v273_v52, %v1076_v51 }
 0x171   :  { %v564_v58 = vpack.c.bf16 %v457_v55, %v456_v54  ;;  %v565_v1 = vpack.c.bf16 %v459_v57, %v458_v63 }
 0x172   :  { %v281_v60 = vpop.permute.xlu1 %280  ;;  %v277_v62 = vpop.permute.xlu0 %276 }
 0x173   :  { %845 = vmatpush3.bf16.msra.mxu0 %v564_v58  ;;  %v461_v2 = vadd.f32 %v281_v60, %v1089_v59  ;;  %v460_v3 = vadd.f32 %v277_v62, %v1094_v61  ;;  %v561_v60 = vpack.c.bf16 %v556_v46, %v555_v45 }
 0x174   :  { %846 = vmatprep.subr.bf16.mxu0 %v923_v0 }
 0x175   :  { %v566_v8 = vpack.c.bf16 %v461_v2, %v460_v3 }
 0x176   :  { %v289_v5 = vpop.permute.xlu1 %288  ;;  %v285_v7 = vpop.permute.xlu0 %284 }
 0x177   :  { %847 = vmatpush3.bf16.msra.mxu0 %v565_v1  ;;  %v463_v9 = vadd.f32 %v289_v5, %v1103_v4  ;;  %v462_v10 = vadd.f32 %v285_v7, %v1108_v6 }
 0x178   :  { %848 = vmatprep.subr.bf16.mxu0 %v923_v0 }
 0x179   :  { %v567_v15 = vpack.c.bf16 %v463_v9, %v462_v10 }
 0x17a   :  { %v297_v12 = vpop.permute.xlu1 %296  ;;  %v293_v14 = vpop.permute.xlu0 %292 }
 0x17b   :  { %849 = vmatpush3.bf16.msra.mxu0 %v566_v8  ;;  %v465_v16 = vadd.f32 %v297_v12, %v1116_v11  ;;  %v464_v17 = vadd.f32 %v293_v14, %v1121_v13 }
 0x17c   :  { %850 = vmatprep.subr.bf16.mxu0 %v923_v0 }
 0x17d   :  { %v568_v22 = vpack.c.bf16 %v465_v16, %v464_v17 }
 0x17e   :  { %v305_v19 = vpop.permute.xlu1 %304  ;;  %v301_v21 = vpop.permute.xlu0 %300 }
 0x17f   :  { %851 = vmatpush3.bf16.msra.mxu0 %v567_v15  ;;  %v467_v23 = vadd.f32 %v305_v19, %v1129_v18  ;;  %v466_v24 = vadd.f32 %v301_v21, %v1134_v20 }
 0x180   :  { %852 = vmatprep.subr.bf16.mxu0 %v923_v0 }
 0x181   :  { %v569_v30 = vpack.c.bf16 %v467_v23, %v466_v24 }
 0x182   :  { %v313_v26 = vpop.permute.xlu1 %312  ;;  %v309_v28 = vpop.permute.xlu0 %308 }
 0x183   :  { %853 = vmatpush3.bf16.msra.mxu0 %v568_v22  ;;  %v469_v31 = vadd.f32 %v313_v26, %v1142_v25  ;;  %v468_v32 = vadd.f32 %v309_v28, %v1147_v27 }
 0x184   :  { %854 = vmatprep.subr.bf16.mxu0 %v923_v0 }
 0x185   :  { %v570_v39 = vpack.c.bf16 %v469_v31, %v468_v32 }
 0x186   :  { %v321_v34 = vpop.permute.xlu1 %320  ;;  %v317_v36 = vpop.permute.xlu0 %316 }
 0x187   :  { %855 = vmatpush3.bf16.msra.mxu0 %v569_v30  ;;  %v471_v43 = vadd.f32 %v321_v34, %v1158_v33  ;;  %v470_v44 = vadd.f32 %v317_v36, %v1163_v35 }
 0x188   :  { %856 = vmatprep.subr.bf16.mxu0 %v923_v0 }
 0x189   :  { %v571_v54 = vpack.c.bf16 %v471_v43, %v470_v44 }
 0x18a   :  { %v332_v47 = vpop.permute.xlu1 %331  ;;  %v328_v48 = vpop.permute.xlu0 %327 }
 0x18b   :  { %v473_v52 = vadd.f32 %v332_v47, %v1071_v50  ;;  %v472_v53 = vadd.f32 %v328_v48, %v1066_v49  ;;  %857 = vmatpush3.bf16.msra.mxu0 %v570_v39 }
 0x18c   :  { %858 = vmatprep.subr.bf16.mxu0 %v923_v0 }
 0x18d   :  { %v572_v55 = vpack.c.bf16 %v473_v52, %v472_v53 }
 0x18e   :  { %v399_v57 = vpop.permute.xlu1 %398  ;;  %v395_v58 = vpop.permute.xlu0 %394 }
 0x18f   :  { %v489_v62 = vadd.f32 %v399_v57, %v1071_v50  ;;  %v488_v63 = vadd.f32 %v395_v58, %v1066_v49  ;;  %859 = vmatpush3.bf16.msra.mxu0 %v571_v54  ;;  %865 = vmatpush3.bf16.msra.mxu1 %v572_v55 }
 0x190   :  { %884 = vmatprep.subr.bf16.mxu0 %v923_v0  ;;  %866 = vmatprep.subr.bf16.mxu1 %v923_v0 }
 0x191   :  { %v580_v40 = vpack.c.bf16 %v489_v62, %v488_v63 }
 0x192   :  { %v340_v1 = vpop.permute.xlu1 %339  ;;  %v336_v2 = vpop.permute.xlu0 %335  ;;  %861 = vmatmul.mubr.bf16.vlgmr.msra.gmra.mrb[4].mxu0 %v561_v60 }
 0x193   :  { %v475_v3 = vadd.f32 %v340_v1, %v1076_v51  ;;  %v474_v5 = vadd.f32 %v336_v2, %v1083_v56  ;;  %885 = vmatpush3.bf16.msra.mxu0 %v580_v40  ;;  %900 = vmatprep.mubr.msk.bf16.mxu0 %vm924_vm0, %v923_v0 }
 0x194   :  { %886 = vmatprep.subr.bf16.mxu0 %v923_v0 }
 0x195   :  { %v573_v49 = vpack.c.bf16 %v475_v3, %v474_v5 }
 0x196   :  { %v407_v50 = vpop.permute.xlu1 %406  ;;  %v403_v7 = vpop.permute.xlu0 %402 }
 0x197   :  { %v491_v8 = vadd.f32 %v407_v50, %v1076_v51  ;;  %v490_v9 = vadd.f32 %v403_v7, %v1083_v56  ;;  %867 = vmatpush3.bf16.msra.mxu1 %v573_v49  ;;  %v758_v7 = vld [vmem:[%s1255_s2 + $0x10] sm:$0xff]  }
 0x198   :  { %868 = vmatprep.subr.bf16.mxu1 %v923_v0 }
 0x199   :  { %v581_v10 = vpack.c.bf16 %v491_v8, %v490_v9 }
 0x19a   :  { %v348_v12 = vpop.permute.xlu1 %347  ;;  %v344_v14 = vpop.permute.xlu0 %343 }
 0x19b   :  { %v477_v15 = vadd.f32 %v348_v12, %v1089_v59  ;;  %v476_v16 = vadd.f32 %v344_v14, %v1094_v61  ;;  %887 = vmatpush3.bf16.msra.mxu0 %v581_v10  ;;  %v755_v14 = vunpack.c.l.bf16 %v758_v7 }
 0x19c   :  { %888 = vmatprep.subr.bf16.mxu0 %v923_v0 }
 0x19d   :  { %v574_v17 = vpack.c.bf16 %v477_v15, %v476_v16  ;;  %v756_v15 = vunpack.c.h.bf16 %v758_v7 }
 0x19e   :  { %v415_v19 = vpop.permute.xlu1 %414  ;;  %v411_v21 = vpop.permute.xlu0 %410 }
 0x19f   :  { %v493_v51 = vadd.f32 %v415_v19, %v1089_v59  ;;  %v492_v56 = vadd.f32 %v411_v21, %v1094_v61  ;;  %869 = vmatpush3.bf16.msra.mxu1 %v574_v17 }
 0x1a0   :  { %870 = vmatprep.subr.bf16.mxu1 %v923_v0 }
 0x1a1   :  { %v582_v22 = vpack.c.bf16 %v493_v51, %v492_v56 }
 0x1a2   :  { %v356_v23 = vpop.permute.xlu1 %355  ;;  %v352_v24 = vpop.permute.xlu0 %351 }
 0x1a3   :  { %v479_v26 = vadd.f32 %v356_v23, %v1103_v4  ;;  %v478_v28 = vadd.f32 %v352_v24, %v1108_v6  ;;  %889 = vmatpush3.bf16.msra.mxu0 %v582_v22  ;;  %v559_v22 = vadd.f32 %v755_v14, %v1061_v42  ;;  %v560_v23 = vadd.f32 %v756_v15, %v1061_v42 }
 0x1a4   :  { %890 = vmatprep.subr.bf16.mxu0 %v923_v0 }
 0x1a5   :  { %v575_v29 = vpack.c.bf16 %v479_v26, %v478_v28 }
 0x1a6   :  { %v423_v30 = vpop.permute.xlu1 %422  ;;  %v419_v31 = vpop.permute.xlu0 %418 }
 0x1a7   :  { %v495_v59 = vadd.f32 %v423_v30, %v1103_v4  ;;  %v494_v61 = vadd.f32 %v419_v31, %v1108_v6  ;;  %871 = vmatpush3.bf16.msra.mxu1 %v575_v29 }
 0x1a8   :  { %872 = vmatprep.subr.bf16.mxu1 %v923_v0 }
 0x1a9   :  { %v583_v32 = vpack.c.bf16 %v495_v59, %v494_v61 }
 0x1aa   :  { %v364_v34 = vpop.permute.xlu1 %363  ;;  %v360_v36 = vpop.permute.xlu0 %359 }
 0x1ab   :  { %v481_v37 = vadd.f32 %v364_v34, %v1116_v11  ;;  %v480_v38 = vadd.f32 %v360_v36, %v1121_v13  ;;  %891 = vmatpush3.bf16.msra.mxu0 %v583_v32 }
 0x1ac   :  { %892 = vmatprep.subr.bf16.mxu0 %v923_v0 }
 0x1ad   :  { %v576_v39 = vpack.c.bf16 %v481_v37, %v480_v38 }
 0x1ae   :  { %v431_v43 = vpop.permute.xlu1 %430  ;;  %v427_v44 = vpop.permute.xlu0 %426 }
 0x1af   :  { %v497_v4 = vadd.f32 %v431_v43, %v1116_v11  ;;  %v496_v6 = vadd.f32 %v427_v44, %v1121_v13  ;;  %873 = vmatpush3.bf16.msra.mxu1 %v576_v39 }
 0x1b0   :  { %874 = vmatprep.subr.bf16.mxu1 %v923_v0 }
 0x1b1   :  { %v584_v45 = vpack.c.bf16 %v497_v4, %v496_v6 }
 0x1b2   :  { %v372_v46 = vpop.permute.xlu1 %371  ;;  %v368_v47 = vpop.permute.xlu0 %367 }
 0x1b3   :  { %v483_v48 = vadd.f32 %v372_v46, %v1129_v18  ;;  %v482_v52 = vadd.f32 %v368_v47, %v1134_v20  ;;  %893 = vmatpush3.bf16.msra.mxu0 %v584_v45 }
 0x1b4   :  { %894 = vmatprep.subr.bf16.mxu0 %v923_v0 }
 0x1b5   :  { %v577_v53 = vpack.c.bf16 %v483_v48, %v482_v52 }
 0x1b6   :  { %v439_v54 = vpop.permute.xlu1 %438  ;;  %v435_v55 = vpop.permute.xlu0 %434 }
 0x1b7   :  { %v499_v11 = vadd.f32 %v439_v54, %v1129_v18  ;;  %v498_v13 = vadd.f32 %v435_v55, %v1134_v20  ;;  %875 = vmatpush3.bf16.msra.mxu1 %v577_v53  ;;  %v757_v18 = vld [vmem:[%s1255_s2 + $0x8] sm:$0xff]  }
 0x1b8   :  { %876 = vmatprep.subr.bf16.mxu1 %v923_v0  ;;  %v751_v5 = vunpack.c.l.bf16 %v757_v18  ;;  %v752_v49 = vunpack.c.h.bf16 %v757_v18 }
 0x1b9   :  { %v585_v57 = vpack.c.bf16 %v499_v11, %v498_v13 }
 0x1ba   :  { %v380_v58 = vpop.permute.xlu1 %379  ;;  %v376_v60 = vpop.permute.xlu0 %375 }
 0x1bb   :  { %v485_v62 = vadd.f32 %v380_v58, %v1142_v25  ;;  %v484_v63 = vadd.f32 %v376_v60, %v1147_v27  ;;  %895 = vmatpush3.bf16.msra.mxu0 %v585_v57 }
 0x1bc   :  { %896 = vmatprep.subr.bf16.mxu0 %v923_v0 }
 0x1bd   :  { %v578_v40 = vpack.c.bf16 %v485_v62, %v484_v63 }
 0x1be   :  { %v447_v1 = vpop.permute.xlu1 %446  ;;  %v443_v20 = vpop.permute.xlu0 %442 }
 0x1bf   :  { %v501_v2 = vadd.f32 %v447_v1, %v1142_v25  ;;  %v500_v3 = vadd.f32 %v443_v20, %v1147_v27  ;;  %877 = vmatpush3.bf16.msra.mxu1 %v578_v40  ;;  %v557_v25 = vadd.f32 %v751_v5, %v1059_v41  ;;  %v558_v27 = vadd.f32 %v752_v49, %v1059_v41 }
 0x1c0   :  { %878 = vmatprep.subr.bf16.mxu1 %v923_v0  ;;  %v563_v41 = vpack.c.bf16 %v560_v23, %v559_v22 }
 0x1c1   :  { %v586_v50 = vpack.c.bf16 %v501_v2, %v500_v3  ;;  %v562_v56 = vpack.c.bf16 %v558_v27, %v557_v25 }
 0x1c2   :  { %v388_v8 = vpop.permute.xlu1 %387  ;;  %v384_v9 = vpop.permute.xlu0 %383 }
 0x1c3   :  { %v487_v10 = vadd.f32 %v388_v8, %v1158_v33  ;;  %v486_v12 = vadd.f32 %v384_v9, %v1163_v35  ;;  %897 = vmatpush3.bf16.msra.mxu0 %v586_v50 }
 0x1c4   :  { %898 = vmatprep.subr.bf16.mxu0 %v923_v0 }
 0x1c5   :  { %v579_v16 = vpack.c.bf16 %v487_v10, %v486_v12 }
 0x1c6   :  { %v455_v17 = vpop.permute.xlu1 %454  ;;  %v451_v19 = vpop.permute.xlu0 %450 }
 0x1c7   :  { %v503_v21 = vadd.f32 %v455_v17, %v1158_v33  ;;  %v502_v51 = vadd.f32 %v451_v19, %v1163_v35  ;;  %879 = vmatpush3.bf16.msra.mxu1 %v579_v16 }
 0x1c9   :  { %v587_v24 = vpack.c.bf16 %v503_v21, %v502_v51 }
 0x1ca   :  { %881 = vmatmul.mubr.bf16.vlgmr.msra.gmra.mrb[4].mxu1 %v562_v56 }
 0x1cb   :  { %899 = vmatpush3.bf16.msra.mxu0 %v587_v24 }
 0x1ce   :  { %901 = vmatmul.mubr.bf16.vlgmr.msra.gmra.mrb[8].mxu0 %v563_v41 }
 0x265   :  { %v622_v0 = vpop.f32.mrb[4].mxu0 }
 0x266   :  { %711 = vst [vmem:[%s1256_s6] sm:$0xff] %v622_v0  ;;  %v862_v26 = vpop.f32.mrb[5].mxu0 }
 0x267   :  { %v625_v33 = vpop.f32.mrb[6].mxu0 }
 0x268   :  { %712 = vst [vmem:[%s1256_s6 + $0x8] sm:$0xff] %v625_v33  ;;  %v863_v35 = vpop.f32.mrb[7].mxu0 }
 0x29d   :  { %v663_v28 = vpop.f32.mrb[4].mxu1 }
 0x29e   :  { %713 = vst [vmem:[%s1256_s6 + $0x10] sm:$0xff] %v663_v28  ;;  %v882_v42 = vpop.f32.mrb[5].mxu1 }
 0x29f   :  { %v666_v29 = vpop.f32.mrb[6].mxu1 }
 0x2a0   :  { %714 = vst [vmem:[%s1256_s6 + $0x18] sm:$0xff] %v666_v29  ;;  %v883_v30 = vpop.f32.mrb[7].mxu1 }
 0x2a1   :  { %v704_v31 = vpop.f32.mrb[8].mxu0 }
 0x2a2   :  { %715 = vst [vmem:[%s1256_s6 + $0x20] sm:$0xff] %v704_v31  ;;  %v902_v59 = vpop.f32.mrb[9].mxu0 }
 0x2a3   :  { %v707_v61 = vpop.f32.mrb[10].mxu0 }
 0x2a4   :  { %716 = vst [vmem:[%s1256_s6 + $0x28] sm:$0xff] %v707_v61  ;;  %v903_v32 = vpop.f32.mrb[11].mxu0 }

// kernel: _meta_forward.3
= control target key start
LH: loop header
LB: loop body
LE: loop exit
PB: predicated region body
PF: predicated region fallthrough
CT: control target
= control target key end

     0   :  { %14 = vsyncpa [#allocation3], 0  ;;  %v995_v1 = vmov 0.0   ;;  %vm996_vm0 = vmmov 0   ;;  %s1340_s0 = inlined_call_operand.vmem [shape: bf16[3,128], index: 0, kind: input, shape index: {}]   ;;  %s1341_s1 = inlined_call_operand.vmem [shape: bf16[3,128], index: 1, kind: input, shape index: {}]   ;;  %s1342_s2 = inlined_call_operand.vmem [shape: bf16[3,16,128], index: 2, kind: input, shape index: {}]   ;;  %s1343_s3 = inlined_call_operand.vmem [shape: f32[128,128], index: 3, kind: input, shape index: {}]   ;;  %s1344_s4 = inlined_call_operand.vmem [shape: bf16[128,128], index: 4, kind: input, shape index: {}]   ;;  %s1345_s5 = inlined_call_operand.vmem [shape: bf16[128,128], index: 5, kind: input, shape index: {}]   ;;  %s1346_s6 = inlined_call_operand.vmem [shape: f32[3,16,128], index: 6, kind: output, shape index: {0}]   ;;  %s1347_s7 = inlined_call_operand.hbm [shape: f32[3,128], index: 7, kind: output, shape index: {1}]   ;;  %s1348_s8 = inlined_call_operand.hbm [shape: f32[3,128], index: 8, kind: output, shape index: {2}]  }
   0x1   :  { %v931_v0 = vld [vmem:[%s1344_s4] sm:$0xff]   ;;  %826 = vmatprep.subr.bf16.mxu0 %v995_v1  ;;  %846 = vmatprep.subr.bf16.mxu1 %v995_v1  ;;  %v932_v2 = vld [vmem:[%s1344_s4 + $0x8] sm:$0xff]   ;;  %v933_v3 = vld [vmem:[%s1344_s4 + $0x10] sm:$0xff]  }
   0x2   :  { %827 = vmatpush3.bf16.msra.mxu0 %v931_v0  ;;  %842 = vmatprep.mubr.msk.bf16.mxu0 %vm996_vm0, %v995_v1  ;;  %v939_v4 = vld [vmem:[%s1345_s5] sm:$0xff]   ;;  %v934_v5 = vld [vmem:[%s1344_s4 + $0x18] sm:$0xff]   ;;  %v940_v6 = vld [vmem:[%s1345_s5 + $0x8] sm:$0xff]  }
   0x3   :  { %828 = vmatprep.subr.bf16.mxu0 %v995_v1  ;;  %862 = vmatprep.mubr.msk.bf16.mxu1 %vm996_vm0, %v995_v1  ;;  %v935_v7 = vld [vmem:[%s1344_s4 + $0x20] sm:$0xff]   ;;  %v941_v8 = vld [vmem:[%s1345_s5 + $0x10] sm:$0xff]  }
   0x4   :  { %847 = vmatpush3.bf16.msra.mxu1 %v939_v4 }
   0x5   :  { %848 = vmatprep.subr.bf16.mxu1 %v995_v1 }
   0x6   :  { %829 = vmatpush3.bf16.msra.mxu0 %v932_v2 }
   0x7   :  { %830 = vmatprep.subr.bf16.mxu0 %v995_v1 }
   0x8   :  { %849 = vmatpush3.bf16.msra.mxu1 %v940_v6 }
   0x9   :  { %850 = vmatprep.subr.bf16.mxu1 %v995_v1 }
   0xa   :  { %831 = vmatpush3.bf16.msra.mxu0 %v933_v3 }
   0xb   :  { %832 = vmatprep.subr.bf16.mxu0 %v995_v1 }
   0xe   :  { %833 = vmatpush3.bf16.msra.mxu0 %v934_v5 }
   0xf   :  { %834 = vmatprep.subr.bf16.mxu0 %v995_v1 }
  0x10   :  { %15 = vsyncpa [#allocation5], 0  ;;  %v936_v9 = vld [vmem:[%s1344_s4 + $0x28] sm:$0xff]   ;;  %851 = vmatpush3.bf16.msra.mxu1 %v941_v8  ;;  %v942_v10 = vld [vmem:[%s1345_s5 + $0x18] sm:$0xff]   ;;  %v257_v19 = vlaneseq  ;;  %v997_v27 = vmov 1966171168  }
  0x11   :  { %852 = vmatprep.subr.bf16.mxu1 %v995_v1  ;;  %v937_v11 = vld [vmem:[%s1344_s4 + $0x30] sm:$0xff]   ;;  %v943_v12 = vld [vmem:[%s1345_s5 + $0x20] sm:$0xff]   ;;  %v938_v13 = vld [vmem:[%s1344_s4 + $0x38] sm:$0xff]   ;;  %v520_v28 = vunpack.c.l.s4 %v997_v27  ;;  %s999_s27 = smov [#allocation4]  }
  0x12   :  { %835 = vmatpush3.bf16.msra.mxu0 %v935_v7  ;;  %v944_v14 = vld [vmem:[%s1345_s5 + $0x28] sm:$0xff]   ;;  %v29_v15 = vld [vmem:[%s1340_s0] sm:$0x3]  ;;  %v945_v16 = vld [vmem:[%s1345_s5 + $0x30] sm:$0xff]   ;;  %v258_v20 = vshrl.u32 %v257_v19, 7  ;;  %s737_s28 = sshll.u32 %s999_s27, 4  ;;  %s738_s28 = int_to_ptr.vmem [resolvable:$true] %s737_s28 }
  0x13   :  { %836 = vmatprep.subr.bf16.mxu0 %v995_v1  ;;  %v946_v17 = vld [vmem:[%s1345_s5 + $0x38] sm:$0xff]   ;;  %v134_v18 = vld [vmem:[%s1341_s1] sm:$0x3]  ;;  %v521_v29 = vunpack.c.0.s8 %v520_v28  ;;  %v1139_v50 = vld [vmem:[%s1343_s3 + $0x8] sm:$0xff] }
  0x14   :  { %853 = vmatpush3.bf16.msra.mxu1 %v942_v10  ;;  %v259_v21 = vsub.s32 0, %v258_v20  ;;  %v326_v43 = vsub.s32 1, %v258_v20  ;;  %v393_v45 = vsub.s32 2, %v258_v20  ;;  %v1134_v49 = vld [vmem:[%s1343_s3] sm:$0xff]  ;;  %v1144_v51 = vld [vmem:[%s1343_s3 + $0x18] sm:$0xff]  ;;  %v1151_v56 = vld [vmem:[%s1343_s3 + $0x10] sm:$0xff] }
  0x15   :  { %854 = vmatprep.subr.bf16.mxu1 %v995_v1  ;;  %v524_v30 = vsub.s32 %v521_v29, %v258_v20  ;;  %v1157_v59 = vld [vmem:[%s1343_s3 + $0x28] sm:$0xff]  ;;  %v1162_v61 = vld [vmem:[%s1343_s3 + $0x20] sm:$0xff]  ;;  %v1171_v4 = vld [vmem:[%s1343_s3 + $0x38] sm:$0xff] }
  0x16   :  { %837 = vmatpush3.bf16.msra.mxu0 %v936_v9  ;;  %v1176_v6 = vld [vmem:[%s1343_s3 + $0x30] sm:$0xff]  ;;  %v1215_v27 = vld [vmem:[%s1343_s3 + $0x60] sm:$0xff] }
  0x17   :  { %838 = vmatprep.subr.bf16.mxu0 %v995_v1  ;;  %v1202_v20 = vld [vmem:[%s1343_s3 + $0x50] sm:$0xff]  ;;  %v768_v29 = vld [vmem:[%s1342_s2] sm:$0xff]  }
  0x18   :  { %855 = vmatpush3.bf16.msra.mxu1 %v943_v12 }
  0x19   :  { %856 = vmatprep.subr.bf16.mxu1 %v995_v1 }
  0x1a   :  { %839 = vmatpush3.bf16.msra.mxu0 %v937_v11  ;;  %v1184_v11 = vld [vmem:[%s1343_s3 + $0x48] sm:$0xff] }
  0x1b   :  { %840 = vmatprep.subr.bf16.mxu0 %v995_v1 }
  0x1c   :  { %857 = vmatpush3.bf16.msra.mxu1 %v944_v14 }
  0x1d   :  { %858 = vmatprep.subr.bf16.mxu1 %v995_v1 }
  0x1e   :  { %841 = vmatpush3.bf16.msra.mxu0 %v938_v13  ;;  %v1189_v13 = vld [vmem:[%s1343_s3 + $0x40] sm:$0xff] }
  0x1f   :  { %866 = vmatprep.subr.bf16.mxu0 %v995_v1 }
  0x20   :  { %859 = vmatpush3.bf16.msra.mxu1 %v945_v16 }
  0x21   :  { %843 = vmatmul.mubr.bf16.vlgmr.msra.gmra.mrb[0].mxu0 %v29_v15  ;;  %860 = vmatprep.subr.bf16.mxu1 %v995_v1 }
  0x22   :  { %882 = vmatprep.mubr.msk.bf16.mxu0 %vm996_vm0, %v995_v1 }
  0x24   :  { %861 = vmatpush3.bf16.msra.mxu1 %v946_v17 }
  0x25   :  { %886 = vmatprep.subr.bf16.mxu1 %v995_v1 }
  0x27   :  { %863 = vmatmul.mubr.bf16.vlgmr.msra.gmra.mrb[0].mxu1 %v134_v18  ;;  %v1197_v18 = vld [vmem:[%s1343_s3 + $0x58] sm:$0xff] }
  0x28   :  { %902 = vmatprep.mubr.msk.bf16.mxu1 %vm996_vm0, %v995_v1 }
  0xf4   :  { %v128_v22 = vpop.f32.mrb[0].mxu0 }
  0xf5   :  { %v260_v23 = vrot.slane %v128_v22, %v259_v21  ;;  %239 = vst [vmem:[#allocation2] sm:$0x7] %v128_v22  ;;  %v844_v24 = vpop.f32.mrb[1].mxu0  ;;  %v327_v44 = vrot.slane %v128_v22, %v326_v43  ;;  %v394_v46 = vrot.slane %v128_v22, %v393_v45 }
  0xf6   :  { %v131_v25 = vpop.f32.mrb[2].mxu0 }
  0xf7   :  { %270 = vbcast.lane.b32.xlu1 %v260_v23, 272  ;;  %262 = vbcast.lane.b32.xlu0 %v260_v23, 256  ;;  %v845_v26 = vpop.f32.mrb[3].mxu0  ;;  %v1210_v25 = vld [vmem:[%s1343_s3 + $0x68] sm:$0xff] }
  0xfa   :  { %v233_v31 = vpop.f32.mrb[0].mxu1 }
  0xfb   :  { %274 = vbcast.lane.b32.xlu1 %v260_v23, 280  ;;  %266 = vbcast.lane.b32.xlu0 %v260_v23, 264  ;;  %v525_v32 = vrot.slane %v233_v31, %v524_v30  ;;  %240 = vst [vmem:[#allocation4] sm:$0x7] %v233_v31  ;;  %v864_v33 = vpop.f32.mrb[1].mxu1 }
  0xfc   :  { %v236_v34 = vpop.f32.mrb[2].mxu1  ;;  %v1226_v33 = vld [vmem:[%s1343_s3 + $0x78] sm:$0xff] }
  0xfd   :  { %v526_v35 = vcombine.high %v525_v32, %v525_v32  ;;  %v533_v36 = vrot.slane %v525_v32, %v524_v30  ;;  %v865_v37 = vpop.f32.mrb[3].mxu1 }
  0xfe   :  { %v769_v37 = vunpack.c.l.bf16 %v768_v29 }
  0xff   :  { %282 = vbcast.lane.b32.xlu1 %v260_v23, 296  ;;  %278 = vbcast.lane.b32.xlu0 %v260_v23, 288  ;;  %v540_v38 = vrot.slane %v526_v35, %v524_v30  ;;  %v541_v39 = vcombine.high %v533_v36, %v533_v36  ;;  %v1125_v40 = vrot.slane %v533_v36, %v259_v21  ;;  %v1231_v35 = vld [vmem:[%s1343_s3 + $0x70] sm:$0xff] }
 0x101   :  { %v1127_v41 = vrot.slane %v540_v38, %v259_v21  ;;  %v1129_v42 = vrot.slane %v541_v39, %v259_v21  ;;  %v770_v38 = vunpack.c.h.bf16 %v768_v29  ;;  %v557_v45 = vadd.f32 %v769_v37, %v1125_v40 }
 0x103   :  { %290 = vbcast.lane.b32.xlu1 %v260_v23, 312  ;;  %286 = vbcast.lane.b32.xlu0 %v260_v23, 304 }
 0x107   :  { %298 = vbcast.lane.b32.xlu1 %v260_v23, 328  ;;  %294 = vbcast.lane.b32.xlu0 %v260_v23, 320 }
 0x10b   :  { %306 = vbcast.lane.b32.xlu1 %v260_v23, 344  ;;  %302 = vbcast.lane.b32.xlu0 %v260_v23, 336 }
 0x10f   :  { %314 = vbcast.lane.b32.xlu1 %v260_v23, 360  ;;  %310 = vbcast.lane.b32.xlu0 %v260_v23, 352 }
 0x113   :  { %322 = vbcast.lane.b32.xlu1 %v260_v23, 376  ;;  %318 = vbcast.lane.b32.xlu0 %v260_v23, 368 }
 0x117   :  { %333 = vbcast.lane.b32.xlu1 %v327_v44, 264  ;;  %329 = vbcast.lane.b32.xlu0 %v327_v44, 256 }
 0x11b   :  { %400 = vbcast.lane.b32.xlu1 %v394_v46, 264  ;;  %396 = vbcast.lane.b32.xlu0 %v394_v46, 256 }
 0x11f   :  { %341 = vbcast.lane.b32.xlu1 %v327_v44, 280  ;;  %337 = vbcast.lane.b32.xlu0 %v327_v44, 272 }
 0x123   :  { %408 = vbcast.lane.b32.xlu1 %v394_v46, 280  ;;  %404 = vbcast.lane.b32.xlu0 %v394_v46, 272 }
 0x127   :  { %349 = vbcast.lane.b32.xlu1 %v327_v44, 296  ;;  %345 = vbcast.lane.b32.xlu0 %v327_v44, 288 }
 0x12b   :  { %416 = vbcast.lane.b32.xlu1 %v394_v46, 296  ;;  %412 = vbcast.lane.b32.xlu0 %v394_v46, 288 }
 0x12f   :  { %357 = vbcast.lane.b32.xlu1 %v327_v44, 312  ;;  %353 = vbcast.lane.b32.xlu0 %v327_v44, 304 }
 0x133   :  { %424 = vbcast.lane.b32.xlu1 %v394_v46, 312  ;;  %420 = vbcast.lane.b32.xlu0 %v394_v46, 304 }
 0x137   :  { %365 = vbcast.lane.b32.xlu1 %v327_v44, 328  ;;  %361 = vbcast.lane.b32.xlu0 %v327_v44, 320 }
 0x13b   :  { %432 = vbcast.lane.b32.xlu1 %v394_v46, 328  ;;  %428 = vbcast.lane.b32.xlu0 %v394_v46, 320 }
 0x13f   :  { %373 = vbcast.lane.b32.xlu1 %v327_v44, 344  ;;  %369 = vbcast.lane.b32.xlu0 %v327_v44, 336 }
 0x143   :  { %440 = vbcast.lane.b32.xlu1 %v394_v46, 344  ;;  %436 = vbcast.lane.b32.xlu0 %v394_v46, 336 }
 0x147   :  { %381 = vbcast.lane.b32.xlu1 %v327_v44, 360  ;;  %377 = vbcast.lane.b32.xlu0 %v327_v44, 352 }
 0x14b   :  { %448 = vbcast.lane.b32.xlu1 %v394_v46, 360  ;;  %444 = vbcast.lane.b32.xlu0 %v394_v46, 352 }
 0x14f   :  { %389 = vbcast.lane.b32.xlu1 %v327_v44, 376  ;;  %385 = vbcast.lane.b32.xlu0 %v327_v44, 368 }
 0x153   :  { %456 = vbcast.lane.b32.xlu1 %v394_v46, 376  ;;  %452 = vbcast.lane.b32.xlu0 %v394_v46, 368  ;;  %v558_v46 = vadd.f32 %v770_v38, %v1125_v40 }
 0x169   :  { %v271_v47 = vpop.permute.xlu1 %270  ;;  %v263_v48 = vpop.permute.xlu0 %262 }
 0x16a   :  { %v458_v54 = vadd.f32 %v263_v48, %v1134_v49  ;;  %v460_v63 = vadd.f32 %v271_v47, %v1151_v56 }
 0x16d   :  { %v275_v52 = vpop.permute.xlu1 %274  ;;  %v267_v53 = vpop.permute.xlu0 %266 }
 0x16e   :  { %v459_v55 = vadd.f32 %v267_v53, %v1139_v50  ;;  %v461_v57 = vadd.f32 %v275_v52, %v1144_v51 }
 0x170   :  { %v566_v58 = vpack.c.bf16 %v459_v55, %v458_v54  ;;  %v567_v0 = vpack.c.bf16 %v461_v57, %v460_v63 }
 0x171   :  { %v283_v60 = vpop.permute.xlu1 %282  ;;  %v279_v62 = vpop.permute.xlu0 %278 }
 0x172   :  { %867 = vmatpush3.bf16.msra.mxu0 %v566_v58  ;;  %v463_v2 = vadd.f32 %v283_v60, %v1157_v59  ;;  %v462_v3 = vadd.f32 %v279_v62, %v1162_v61  ;;  %v563_v60 = vpack.c.bf16 %v558_v46, %v557_v45 }
 0x173   :  { %868 = vmatprep.subr.bf16.mxu0 %v995_v1 }
 0x174   :  { %v568_v8 = vpack.c.bf16 %v463_v2, %v462_v3 }
 0x175   :  { %v291_v5 = vpop.permute.xlu1 %290  ;;  %v287_v7 = vpop.permute.xlu0 %286 }
 0x176   :  { %869 = vmatpush3.bf16.msra.mxu0 %v567_v0  ;;  %v465_v9 = vadd.f32 %v291_v5, %v1171_v4  ;;  %v464_v10 = vadd.f32 %v287_v7, %v1176_v6 }
 0x177   :  { %870 = vmatprep.subr.bf16.mxu0 %v995_v1 }
 0x178   :  { %v569_v15 = vpack.c.bf16 %v465_v9, %v464_v10 }
 0x179   :  { %v299_v12 = vpop.permute.xlu1 %298  ;;  %v295_v14 = vpop.permute.xlu0 %294 }
 0x17a   :  { %871 = vmatpush3.bf16.msra.mxu0 %v568_v8  ;;  %v467_v16 = vadd.f32 %v299_v12, %v1184_v11  ;;  %v466_v17 = vadd.f32 %v295_v14, %v1189_v13 }
 0x17b   :  { %872 = vmatprep.subr.bf16.mxu0 %v995_v1 }
 0x17c   :  { %v570_v22 = vpack.c.bf16 %v467_v16, %v466_v17 }
 0x17d   :  { %v307_v19 = vpop.permute.xlu1 %306  ;;  %v303_v21 = vpop.permute.xlu0 %302 }
 0x17e   :  { %873 = vmatpush3.bf16.msra.mxu0 %v569_v15  ;;  %v469_v23 = vadd.f32 %v307_v19, %v1197_v18  ;;  %v468_v24 = vadd.f32 %v303_v21, %v1202_v20 }
 0x17f   :  { %874 = vmatprep.subr.bf16.mxu0 %v995_v1 }
 0x180   :  { %v571_v30 = vpack.c.bf16 %v469_v23, %v468_v24 }
 0x181   :  { %v315_v26 = vpop.permute.xlu1 %314  ;;  %v311_v28 = vpop.permute.xlu0 %310 }
 0x182   :  { %875 = vmatpush3.bf16.msra.mxu0 %v570_v22  ;;  %v471_v31 = vadd.f32 %v315_v26, %v1210_v25  ;;  %v470_v32 = vadd.f32 %v311_v28, %v1215_v27 }
 0x183   :  { %876 = vmatprep.subr.bf16.mxu0 %v995_v1 }
 0x184   :  { %v572_v39 = vpack.c.bf16 %v471_v31, %v470_v32 }
 0x185   :  { %v323_v34 = vpop.permute.xlu1 %322  ;;  %v319_v36 = vpop.permute.xlu0 %318 }
 0x186   :  { %877 = vmatpush3.bf16.msra.mxu0 %v571_v30  ;;  %v473_v43 = vadd.f32 %v323_v34, %v1226_v33  ;;  %v472_v44 = vadd.f32 %v319_v36, %v1231_v35 }
 0x187   :  { %878 = vmatprep.subr.bf16.mxu0 %v995_v1 }
 0x188   :  { %v573_v54 = vpack.c.bf16 %v473_v43, %v472_v44 }
 0x189   :  { %v334_v47 = vpop.permute.xlu1 %333  ;;  %v330_v48 = vpop.permute.xlu0 %329 }
 0x18a   :  { %v475_v52 = vadd.f32 %v334_v47, %v1139_v50  ;;  %v474_v53 = vadd.f32 %v330_v48, %v1134_v49  ;;  %879 = vmatpush3.bf16.msra.mxu0 %v572_v39 }
 0x18b   :  { %880 = vmatprep.subr.bf16.mxu0 %v995_v1 }
 0x18c   :  { %v574_v55 = vpack.c.bf16 %v475_v52, %v474_v53 }
 0x18d   :  { %v401_v57 = vpop.permute.xlu1 %400  ;;  %v397_v58 = vpop.permute.xlu0 %396 }
 0x18e   :  { %v491_v62 = vadd.f32 %v401_v57, %v1139_v50  ;;  %v490_v63 = vadd.f32 %v397_v58, %v1134_v49  ;;  %881 = vmatpush3.bf16.msra.mxu0 %v573_v54  ;;  %887 = vmatpush3.bf16.msra.mxu1 %v574_v55 }
 0x18f   :  { %906 = vmatprep.subr.bf16.mxu0 %v995_v1  ;;  %888 = vmatprep.subr.bf16.mxu1 %v995_v1 }
 0x190   :  { %v582_v40 = vpack.c.bf16 %v491_v62, %v490_v63 }
 0x191   :  { %v342_v0 = vpop.permute.xlu1 %341  ;;  %v338_v2 = vpop.permute.xlu0 %337  ;;  %883 = vmatmul.mubr.bf16.vlgmr.msra.gmra.mrb[4].mxu0 %v563_v60 }
 0x192   :  { %v477_v3 = vadd.f32 %v342_v0, %v1144_v51  ;;  %v476_v5 = vadd.f32 %v338_v2, %v1151_v56  ;;  %907 = vmatpush3.bf16.msra.mxu0 %v582_v40  ;;  %922 = vmatprep.mubr.msk.bf16.mxu0 %vm996_vm0, %v995_v1 }
 0x193   :  { %908 = vmatprep.subr.bf16.mxu0 %v995_v1 }
 0x194   :  { %v575_v49 = vpack.c.bf16 %v477_v3, %v476_v5 }
 0x195   :  { %v409_v50 = vpop.permute.xlu1 %408  ;;  %v405_v7 = vpop.permute.xlu0 %404 }
 0x196   :  { %v493_v8 = vadd.f32 %v409_v50, %v1144_v51  ;;  %v492_v9 = vadd.f32 %v405_v7, %v1151_v56  ;;  %889 = vmatpush3.bf16.msra.mxu1 %v575_v49  ;;  %v780_v7 = vld [vmem:[%s1342_s2 + $0x10] sm:$0xff]  }
 0x197   :  { %890 = vmatprep.subr.bf16.mxu1 %v995_v1 }
 0x198   :  { %v583_v10 = vpack.c.bf16 %v493_v8, %v492_v9 }
 0x199   :  { %v350_v12 = vpop.permute.xlu1 %349  ;;  %v346_v14 = vpop.permute.xlu0 %345 }
 0x19a   :  { %v479_v15 = vadd.f32 %v350_v12, %v1157_v59  ;;  %v478_v16 = vadd.f32 %v346_v14, %v1162_v61  ;;  %909 = vmatpush3.bf16.msra.mxu0 %v583_v10  ;;  %v777_v14 = vunpack.c.l.bf16 %v780_v7 }
 0x19b   :  { %910 = vmatprep.subr.bf16.mxu0 %v995_v1 }
 0x19c   :  { %v576_v17 = vpack.c.bf16 %v479_v15, %v478_v16  ;;  %v778_v15 = vunpack.c.h.bf16 %v780_v7 }
 0x19d   :  { %v417_v19 = vpop.permute.xlu1 %416  ;;  %v413_v21 = vpop.permute.xlu0 %412 }
 0x19e   :  { %v495_v51 = vadd.f32 %v417_v19, %v1157_v59  ;;  %v494_v56 = vadd.f32 %v413_v21, %v1162_v61  ;;  %891 = vmatpush3.bf16.msra.mxu1 %v576_v17 }
 0x19f   :  { %892 = vmatprep.subr.bf16.mxu1 %v995_v1 }
 0x1a0   :  { %v584_v22 = vpack.c.bf16 %v495_v51, %v494_v56 }
 0x1a1   :  { %v358_v23 = vpop.permute.xlu1 %357  ;;  %v354_v24 = vpop.permute.xlu0 %353 }
 0x1a2   :  { %v481_v26 = vadd.f32 %v358_v23, %v1171_v4  ;;  %v480_v28 = vadd.f32 %v354_v24, %v1176_v6  ;;  %911 = vmatpush3.bf16.msra.mxu0 %v584_v22  ;;  %v561_v22 = vadd.f32 %v777_v14, %v1129_v42  ;;  %v562_v23 = vadd.f32 %v778_v15, %v1129_v42 }
 0x1a3   :  { %912 = vmatprep.subr.bf16.mxu0 %v995_v1 }
 0x1a4   :  { %v577_v29 = vpack.c.bf16 %v481_v26, %v480_v28 }
 0x1a5   :  { %v425_v30 = vpop.permute.xlu1 %424  ;;  %v421_v31 = vpop.permute.xlu0 %420 }
 0x1a6   :  { %v497_v59 = vadd.f32 %v425_v30, %v1171_v4  ;;  %v496_v61 = vadd.f32 %v421_v31, %v1176_v6  ;;  %893 = vmatpush3.bf16.msra.mxu1 %v577_v29 }
 0x1a7   :  { %894 = vmatprep.subr.bf16.mxu1 %v995_v1 }
 0x1a8   :  { %v585_v32 = vpack.c.bf16 %v497_v59, %v496_v61 }
 0x1a9   :  { %v366_v34 = vpop.permute.xlu1 %365  ;;  %v362_v36 = vpop.permute.xlu0 %361 }
 0x1aa   :  { %v483_v37 = vadd.f32 %v366_v34, %v1184_v11  ;;  %v482_v38 = vadd.f32 %v362_v36, %v1189_v13  ;;  %913 = vmatpush3.bf16.msra.mxu0 %v585_v32 }
 0x1ab   :  { %914 = vmatprep.subr.bf16.mxu0 %v995_v1 }
 0x1ac   :  { %v578_v39 = vpack.c.bf16 %v483_v37, %v482_v38 }
 0x1ad   :  { %v433_v43 = vpop.permute.xlu1 %432  ;;  %v429_v44 = vpop.permute.xlu0 %428 }
 0x1ae   :  { %v499_v4 = vadd.f32 %v433_v43, %v1184_v11  ;;  %v498_v6 = vadd.f32 %v429_v44, %v1189_v13  ;;  %895 = vmatpush3.bf16.msra.mxu1 %v578_v39 }
 0x1af   :  { %896 = vmatprep.subr.bf16.mxu1 %v995_v1 }
 0x1b0   :  { %v586_v45 = vpack.c.bf16 %v499_v4, %v498_v6 }
 0x1b1   :  { %v374_v46 = vpop.permute.xlu1 %373  ;;  %v370_v47 = vpop.permute.xlu0 %369 }
 0x1b2   :  { %v485_v48 = vadd.f32 %v374_v46, %v1197_v18  ;;  %v484_v52 = vadd.f32 %v370_v47, %v1202_v20  ;;  %915 = vmatpush3.bf16.msra.mxu0 %v586_v45 }
 0x1b3   :  { %916 = vmatprep.subr.bf16.mxu0 %v995_v1 }
 0x1b4   :  { %v579_v53 = vpack.c.bf16 %v485_v48, %v484_v52 }
 0x1b5   :  { %v441_v54 = vpop.permute.xlu1 %440  ;;  %v437_v55 = vpop.permute.xlu0 %436 }
 0x1b6   :  { %v501_v11 = vadd.f32 %v441_v54, %v1197_v18  ;;  %v500_v13 = vadd.f32 %v437_v55, %v1202_v20  ;;  %897 = vmatpush3.bf16.msra.mxu1 %v579_v53  ;;  %v779_v18 = vld [vmem:[%s1342_s2 + $0x8] sm:$0xff]   ;;  %s998_s2 = smov [#allocation2]  }
 0x1b7   :  { %898 = vmatprep.subr.bf16.mxu1 %v995_v1  ;;  %v773_v5 = vunpack.c.l.bf16 %v779_v18  ;;  %v774_v49 = vunpack.c.h.bf16 %v779_v18  ;;  %s727_s26 = sshll.u32 %s998_s2, 4  ;;  %s728_s26 = int_to_ptr.vmem [resolvable:$true] %s727_s26 }
 0x1b8   :  { %v587_v57 = vpack.c.bf16 %v501_v11, %v500_v13  ;;  %s947_s29 = scalar_lea.vmem %s728_s26, 64  ;;  %p952_p1 = scmp.lt.s32.totalorder %s728_s26, %s728_s26 }
 0x1b9   :  { %v382_v58 = vpop.permute.xlu1 %381  ;;  %v378_v60 = vpop.permute.xlu0 %377  ;;  %p948_p0 = scmp.ne.s32.totalorder %s728_s26, %s947_s29  ;;  %p953_p2 = scmp.lt.s32.totalorder %s947_s29, %s947_s29 }
 0x1ba   :  { %v487_v62 = vadd.f32 %v382_v58, %v1210_v25  ;;  %v486_v63 = vadd.f32 %v378_v60, %v1215_v27  ;;  %917 = vmatpush3.bf16.msra.mxu0 %v587_v57 }
 0x1bb   :  { %918 = vmatprep.subr.bf16.mxu0 %v995_v1  ;;  %p954_p3 = por %p953_p2, %p952_p1 }
 0x1bc   :  { %v580_v40 = vpack.c.bf16 %v487_v62, %v486_v63 }
 0x1bd   :  { %v449_v0 = vpop.permute.xlu1 %448  ;;  %v445_v20 = vpop.permute.xlu0 %444  ;;  %p955_p4 = pnand %p954_p3, %p948_p0 }
 0x1be   :  { %v503_v2 = vadd.f32 %v449_v0, %v1210_v25  ;;  %v502_v3 = vadd.f32 %v445_v20, %v1215_v27  ;;  %899 = vmatpush3.bf16.msra.mxu1 %v580_v40  ;;  %v559_v25 = vadd.f32 %v773_v5, %v1127_v41  ;;  %v560_v27 = vadd.f32 %v774_v49, %v1127_v41 }
 0x1bf   :  { %900 = vmatprep.subr.bf16.mxu1 %v995_v1  ;;  %v565_v41 = vpack.c.bf16 %v562_v23, %v561_v22 }
 0x1c0   :  { %v588_v50 = vpack.c.bf16 %v503_v2, %v502_v3  ;;  %v564_v56 = vpack.c.bf16 %v560_v27, %v559_v25 }
 0x1c1   :  { %v390_v8 = vpop.permute.xlu1 %389  ;;  %v386_v9 = vpop.permute.xlu0 %385 }
 0x1c2   :  { %v489_v10 = vadd.f32 %v390_v8, %v1226_v33  ;;  %v488_v12 = vadd.f32 %v386_v9, %v1231_v35  ;;  %919 = vmatpush3.bf16.msra.mxu0 %v588_v50 }
 0x1c3   :  { %920 = vmatprep.subr.bf16.mxu0 %v995_v1 }
 0x1c4   :  { %v581_v16 = vpack.c.bf16 %v489_v10, %v488_v12 }
 0x1c5   :  { %v457_v17 = vpop.permute.xlu1 %456  ;;  %v453_v19 = vpop.permute.xlu0 %452 }
 0x1c6   :  { %v505_v21 = vadd.f32 %v457_v17, %v1226_v33  ;;  %v504_v51 = vadd.f32 %v453_v19, %v1231_v35  ;;  %901 = vmatpush3.bf16.msra.mxu1 %v581_v16 }
 0x1c8   :  { %v589_v24 = vpack.c.bf16 %v505_v21, %v504_v51 }
 0x1c9   :  { %903 = vmatmul.mubr.bf16.vlgmr.msra.gmra.mrb[4].mxu1 %v564_v56 }
 0x1ca   :  { %921 = vmatpush3.bf16.msra.mxu0 %v589_v24 }
 0x1cd   :  { %923 = vmatmul.mubr.bf16.vlgmr.msra.gmra.mrb[8].mxu0 %v565_v41 }
 0x1ce   :  { %958 = shalt.err (!%p955_p4)
}
 0x1cf   :  { %s959_s10 = scalar_lea.hbm %s1347_s7, 64 }
 0x1d0   :  { %p960_p5 = scmp.ne.s32.totalorder %s1347_s7, %s959_s10  ;;  %p963_p6 = scmp.lt.u32.totalorder %s959_s10, %s1347_s7 }
 0x1d2   :  { %p965_p7 = pnand %p963_p6, %p960_p5 }
 0x1d4   :  { %968 = shalt.err (!%p965_p7)
}
 0x1d5   :  { %730 = dma.vmem_to_hbm [thread:$0]  %s728_s26, 64, %s1347_s7, [#allocation3]  }
 0x1d6   :  { %s969_s0 = scalar_lea.vmem %s738_s28, 64  ;;  %p974_p9 = scmp.lt.s32.totalorder %s738_s28, %s738_s28 }
 0x1d7   :  { %p970_p8 = scmp.ne.s32.totalorder %s738_s28, %s969_s0  ;;  %p975_p10 = scmp.lt.s32.totalorder %s969_s0, %s969_s0 }
 0x1d9   :  { %p976_p11 = por %p975_p10, %p974_p9 }
 0x1db   :  { %p977_p12 = pnand %p976_p11, %p970_p8 }
 0x1dd   :  { %980 = shalt.err (!%p977_p12)
}
 0x1de   :  { %s981_s5 = scalar_lea.hbm %s1348_s8, 64 }
 0x1df   :  { %p982_p13 = scmp.ne.s32.totalorder %s1348_s8, %s981_s5  ;;  %p985_p0 = scmp.lt.u32.totalorder %s981_s5, %s1348_s8 }
 0x1e1   :  { %p987_p1 = pnand %p985_p0, %p982_p13 }
 0x1e3   :  { %990 = shalt.err (!%p987_p1)
}
 0x1e4   :  { %740 = dma.vmem_to_hbm [thread:$0]  %s738_s28, 64, %s1348_s8, [#allocation5]  }
 0x264   :  { %v624_v1 = vpop.f32.mrb[4].mxu0 }
 0x265   :  { %713 = vst [vmem:[%s1346_s6] sm:$0xff] %v624_v1  ;;  %v884_v42 = vpop.f32.mrb[5].mxu0 }
 0x266   :  { %v627_v33 = vpop.f32.mrb[6].mxu0 }
 0x267   :  { %714 = vst [vmem:[%s1346_s6 + $0x8] sm:$0xff] %v627_v33  ;;  %v885_v35 = vpop.f32.mrb[7].mxu0 }
 0x29c   :  { %v665_v26 = vpop.f32.mrb[4].mxu1 }
 0x29d   :  { %715 = vst [vmem:[%s1346_s6 + $0x10] sm:$0xff] %v665_v26  ;;  %v904_v28 = vpop.f32.mrb[5].mxu1 }
 0x29e   :  { %v668_v29 = vpop.f32.mrb[6].mxu1 }
 0x29f   :  { %716 = vst [vmem:[%s1346_s6 + $0x18] sm:$0xff] %v668_v29  ;;  %v905_v30 = vpop.f32.mrb[7].mxu1 }
 0x2a0   :  { %v706_v31 = vpop.f32.mrb[8].mxu0 }
 0x2a1   :  { %717 = vst [vmem:[%s1346_s6 + $0x20] sm:$0xff] %v706_v31  ;;  %v924_v59 = vpop.f32.mrb[9].mxu0 }
 0x2a2   :  { %v709_v61 = vpop.f32.mrb[10].mxu0 }
 0x2a3   :  { %718 = vst [vmem:[%s1346_s6 + $0x28] sm:$0xff] %v709_v61  ;;  %v925_v32 = vpop.f32.mrb[11].mxu0 }
 0x2a4   :  { %991 = dma.done.wait [#allocation3], 64  }
 0x2a5   :  { %992 = vsyncadd [#allocation3], 4294967232 }
 0x2a6   :  { %993 = dma.done.wait [#allocation5], 64  }
 0x2a7   :  { %994 = vsyncadd [#allocation5], 4294967232 }
 0x2a8   :  { %749 = vsyncpa [#allocation3], 1 }
 0x2a9   :  { %750 = vsyncpa [#allocation5], 1 }

</bundles_post_ra>
